<compile_context>
chip_gen: v5e
topology: v5e:2x2
jax: 0.10.0
libtpu: 0.0.40
codegen_flags: <defaults>
</compile_context>

<pallas_src>
import functools

import jax
import jax.numpy as jnp
from jax.experimental import pallas as pl
from jax.experimental.pallas import tpu as pltpu

EPS = 1e-5  # nn.LayerNorm default
_INV_SQRT2 = 0.7071067811865476


# ---------------------------------------------------------------------------
# In-kernel helpers (f32 math)
# ---------------------------------------------------------------------------
def _layernorm(x, gamma, beta):
    # Single-sweep LN: mean and mean-of-squares, var = E[x^2] - E[x]^2.
    mu = jnp.mean(x, axis=-1, keepdims=True)
    var = jnp.mean(x * x, axis=-1, keepdims=True) - mu * mu
    return (x - mu) * jax.lax.rsqrt(var + EPS) * gamma + beta


def _gelu(x, approx=True):
    if approx:
        # tanh approximation rides the EUP slot (much cheaper than erf on VALU).
        return jax.nn.gelu(x, approximate=True)
    # Exact erf GELU — matches torch.nn.GELU() default bit-for-bit (modulo bf16).
    return 0.5 * x * (1.0 + jax.lax.erf(x * _INV_SQRT2))


# ---------------------------------------------------------------------------
# Fused kernel: patch-embed -> L mixer blocks -> LN -> pool -> classifier
# ---------------------------------------------------------------------------
def _mixer_fused_kernel(
    patches_ref, embed_w_ref, embed_b_ref,
    pack_ref, tw1_ref, tb1_ref, tw2_ref, tb2_ref, cw1_ref, cw2_ref,
    norm_g_ref, norm_b_ref, cls_w_ref, cls_b_ref,
    out_ref, tok_ref,
    *, num_patches, hidden_dim, channels_hidden_dim,
    tile_batch, channel_chunk_rows, approx_gelu,
):
    layer = pl.program_id(1)
    P, C, CH, TB = num_patches, hidden_dim, channels_hidden_dim, tile_batch
    rows = TB * P
    gelu = functools.partial(_gelu, approx=approx_gelu)

    # ---- Patch embedding: once per batch tile, at the first layer step -----
    @pl.when(layer == 0)
    def _embed():
        tok_ref[...] = (
            jnp.dot(patches_ref[...], embed_w_ref[...],        # bf16 x bf16
                    preferred_element_type=jnp.float32)
            + embed_b_ref[...]
        )

    x = tok_ref[...]                                            # (rows, C) f32

    # ---- Token mixing -------------------------------------------------------
    ln1g = pack_ref[0:1, :C]
    ln1b = pack_ref[1:2, :C]
    y = _layernorm(x, ln1g, ln1b).astype(jnp.bfloat16)          # (rows, C)
    tw1 = tw1_ref[...]                                          # (TH, P)  bf16
    tw2 = tw2_ref[...]                                          # (P, TH)  bf16
    tb1 = tb1_ref[...]                                          # (TH, 1)  f32
    tb2 = tb2_ref[...]                                          # (P, 1)   f32
    if TB == 1:
        ht = jnp.dot(tw1, y, preferred_element_type=jnp.float32) + tb1
        g = gelu(ht).astype(jnp.bfloat16)
        x = x + jnp.dot(tw2, g, preferred_element_type=jnp.float32) + tb2
    else:
        # No concatenate: per-batch residuals go straight into tok_ref slices.
        # TODO(synk): for very large tile_batch fold batch into the matmul N
        # dimension ((TH,P)@(P,TB*C)) to keep the 256x256 MXU full.
        for b in range(TB):
            yb = y[b * P:(b + 1) * P, :]                        # (P, C) bf16
            ht = jnp.dot(tw1, yb, preferred_element_type=jnp.float32) + tb1
            g = gelu(ht).astype(jnp.bfloat16)
            ob = jnp.dot(tw2, g, preferred_element_type=jnp.float32) + tb2
            tok_ref[b * P:(b + 1) * P, :] = x[b * P:(b + 1) * P, :] + ob
        x = tok_ref[...]

    # ---- Channel mixing -----------------------------------------------------
    ln2g = pack_ref[2:3, :C]
    ln2b = pack_ref[3:4, :C]
    cb1 = pack_ref[4:5, :CH]
    cb2 = pack_ref[5:6, :C]
    y = _layernorm(x, ln2g, ln2b).astype(jnp.bfloat16)          # (rows, C)
    cw1 = cw1_ref[...]                                          # (C, CH) bf16
    cw2 = cw2_ref[...]                                          # (CH, C) bf16
    chunk = channel_chunk_rows
    if chunk is None or rows <= chunk or rows % chunk:
        h = gelu(jnp.dot(y, cw1, preferred_element_type=jnp.float32) + cb1)
        d = jnp.dot(h.astype(jnp.bfloat16), cw2,
                    preferred_element_type=jnp.float32) + cb2
        x = x + d
        tok_ref[...] = x
    else:
        # Bound the (rows, CH) f32 hidden to (chunk, CH): needed to keep a big
        # tile_batch within v7x's 64 MiB VMEM.
        for ci in range(rows // chunk):
            r = slice(ci * chunk, (ci + 1) * chunk)
            h = gelu(jnp.dot(y[r, :], cw1,
                             preferred_element_type=jnp.float32) + cb1)
            d = jnp.dot(h.astype(jnp.bfloat16), cw2,
                        preferred_element_type=jnp.float32) + cb2
            tok_ref[r, :] = x[r, :] + d
        x = tok_ref[...]

    # ---- Head: final LN -> mean over patches -> Linear (last layer only) ---
    @pl.when(layer == pl.num_programs(1) - 1)
    def _head():
        z = _layernorm(x, norm_g_ref[...], norm_b_ref[...])    # (rows, C)
        pooled = [jnp.mean(z[b * P:(b + 1) * P, :], axis=0, keepdims=True)
                  for b in range(TB)]
        p = pooled[0] if TB == 1 else jnp.concatenate(pooled, axis=0)
        out_ref[...] = (
            jnp.dot(p.astype(jnp.bfloat16), cls_w_ref[...],
                    preferred_element_type=jnp.float32)
            + cls_b_ref[...]
        ).astype(out_ref.dtype)


# ---------------------------------------------------------------------------
# Glue: patch extraction (reshape/transpose only)
# ---------------------------------------------------------------------------
def extract_patches(x, p):
    # (B, Cin, H, W) -> (B*num_patches, Cin*p*p); patch order h-major then w,
    # per-patch flatten order (Cin, kh, kw) — matches Conv2d(stride=patch)
    # followed by Rearrange('b c h w -> b (h w) c').
    B, C, H, W = x.shape
    x = x.reshape(B, C, H // p, p, W // p, p)
    x = x.transpose(0, 2, 4, 1, 3, 5)            # (B, Hp, Wp, C, p, p)
    return x.reshape(B * (H // p) * (W // p), C * p * p)


def _vmem_limit_bytes():
    # ~96-100 MiB on 128 MiB chips (v5e/v6e), ~48 MiB on v7x (64 MiB physical).
    try:
        cap = int(pltpu.get_tpu_info().vmem_capacity_bytes)
    except Exception:
        cap = 128 * 1024 * 1024
    return min(100 * 1024 * 1024, (cap * 3) // 4)


def _choose_tile_batch(batch, *, num_patches, hidden_dim, channels_hidden_dim,
                       d_in, chunk_rows):
    # bt = batch // tile_batch should equal the number of TensorCores so every
    # stacked per-layer weight is streamed from HBM exactly once per core:
    # 1 TC on v5e/v6e, 2 TCs on v7x (keeps both cores busy via the "parallel"
    # batch-tile axis).
    try:
        kind = jax.devices()[0].device_kind.lower()
    except Exception:
        kind = ""
    n_tc = 2 if ("v7" in kind or "7x" in kind) else 1
    tb = max(1, batch // n_tc)
    while batch % tb:
        tb -= 1

    # Cap tile_batch so per-tile activations fit comfortably in VMEM.
    budget = int(_vmem_limit_bytes() * 0.5)

    def tile_bytes(t):
        r = t * num_patches
        act = r * hidden_dim * 4                                 # resident f32
        patch = 2 * r * d_in * 2                                 # 2x bf16 buffers
        hid_rows = r if chunk_rows is None else min(r, chunk_rows)
        hidden = hid_rows * channels_hidden_dim * (4 + 2)        # f32 + bf16 copy
        ln = r * hidden_dim * (4 + 2)                            # LN out f32+bf16
        return act + patch + hidden + ln

    while tb > 1 and (tile_bytes(tb) > budget or batch % tb):
        tb -= 1
    return tb


# ---------------------------------------------------------------------------
# Parameter init (matmul weights bf16, LN / biases f32, lane-major 2-D;
# the small per-layer vectors are packed into one (L, 6, W) array).
# ---------------------------------------------------------------------------
def init_params(key, *, channels, patch_size, hidden_dim, num_patches,
                tokens_hidden_dim, channels_hidden_dim, num_layers, num_classes):
    ks = jax.random.split(key, 12)
    scale = 0.02

    def rnd(k, shape, dtype=jnp.float32):
        return (scale * jax.random.normal(k, shape, jnp.float32)).astype(dtype)

    d_in = channels * patch_size * patch_size
    L, P, C = num_layers, num_patches, hidden_dim
    TH, CH = tokens_hidden_dim, channels_hidden_dim
    Wp = max(C, CH)

    def pad_lanes(a):
        return jnp.pad(a, ((0, 0), (0, 0), (0, Wp - a.shape[-1])))

    # Packed per-layer "small" params (L, 6, Wp):
    #   row 0/1: token-mix LN gamma / beta  (width C)
    #   row 2/3: channel-mix LN gamma / beta (width C)
    #   row 4  : channel-mix hidden bias     (width CH)
    #   row 5  : channel-mix output bias     (width C)
    pack = jnp.concatenate(
        [pad_lanes(jnp.ones((L, 1, C), jnp.float32)),     # ln1_g
         pad_lanes(jnp.zeros((L, 1, C), jnp.float32)),    # ln1_b
         pad_lanes(jnp.ones((L, 1, C), jnp.float32)),     # ln2_g
         pad_lanes(jnp.zeros((L, 1, C), jnp.float32)),    # ln2_b
         pad_lanes(rnd(ks[7], (L, 1, CH))),               # ch_b1
         pad_lanes(rnd(ks[9], (L, 1, C)))],               # ch_b2
        axis=1)

    params = {
        "embed_w": rnd(ks[0], (d_in, C), jnp.bfloat16),   # Conv2d weight, flat^T
        "embed_b": rnd(ks[1], (1, C)),
        "blocks": {                                       # stacked along layers
            "pack": pack,
            "tok_w1": rnd(ks[2], (L, TH, P), jnp.bfloat16),   # Linear(P -> TH) W
            "tok_b1": rnd(ks[3], (L, TH, 1)),
            "tok_w2": rnd(ks[4], (L, P, TH), jnp.bfloat16),   # Linear(TH -> P) W
            "tok_b2": rnd(ks[5], (L, P, 1)),
            "ch_w1": rnd(ks[6], (L, C, CH), jnp.bfloat16),    # Linear(C -> CH) W^T
            "ch_w2": rnd(ks[8], (L, CH, C), jnp.bfloat16),    # Linear(CH -> C) W^T
        },
        "norm_g": jnp.ones((1, C), jnp.float32),
        "norm_b": jnp.zeros((1, C), jnp.float32),
        # Classifier weight zero-initialized (nn.init.zeros_); bias keeps a
        # (random) non-zero init like torch's default.
        "cls_w": jnp.zeros((C, num_classes), jnp.bfloat16),
        "cls_b": rnd(ks[10], (1, num_classes)),
    }
    return params


# ---------------------------------------------------------------------------
# Full forward pass (single fused pallas_call)
# ---------------------------------------------------------------------------
_LAYER_ARG_KEYS = ("pack", "tok_w1", "tok_b1", "tok_w2", "tok_b2",
                   "ch_w1", "ch_w2")


def mlp_mixer_forward(x, params, *, patch_size, num_patches, hidden_dim,
                      tile_batch=None, channel_chunk_rows=512,
                      approx_gelu=True):
    B, Cin, _, _ = x.shape
    P, C = num_patches, hidden_dim
    d_in = Cin * patch_size * patch_size
    blocks = params["blocks"]
    L = blocks["ch_w1"].shape[0]
    CH = blocks["ch_w1"].shape[2]
    num_classes = params["cls_w"].shape[1]

    if tile_batch is None:
        tile_batch = _choose_tile_batch(
            B, num_patches=P, hidden_dim=C, channels_hidden_dim=CH,
            d_in=d_in, chunk_rows=channel_chunk_rows)
    assert B % tile_batch == 0, (B, tile_batch)
    bt = B // tile_batch                      # batch tiles -> parallel grid axis

    # bf16 patches on the host: halves the largest per-tile DMA; the embed
    # matmul consumes bf16 anyway (f32 accumulation on the MXU).
    patches = extract_patches(x, patch_size).astype(jnp.bfloat16)
    patches = patches.reshape(bt, tile_batch * P, d_in)

    layer_args = [blocks[k] for k in _LAYER_ARG_KEYS]

    def const_spec(arr):                      # fetched once; constant block index
        return pl.BlockSpec(arr.shape, lambda i, l: (0,) * arr.ndim)

    def layer_spec(arr):                      # stream one layer slice per step
        return pl.BlockSpec((None,) + arr.shape[1:], lambda i, l: (l, 0, 0))

    in_specs = (
        [pl.BlockSpec((None, tile_batch * P, d_in), lambda i, l: (i, 0, 0)),
         const_spec(params["embed_w"]), const_spec(params["embed_b"])]
        + [layer_spec(a) for a in layer_args]
        + [const_spec(params["norm_g"]), const_spec(params["norm_b"]),
           const_spec(params["cls_w"]), const_spec(params["cls_b"])]
    )

    kernel = functools.partial(
        _mixer_fused_kernel,
        num_patches=P, hidden_dim=C, channels_hidden_dim=CH,
        tile_batch=tile_batch, channel_chunk_rows=channel_chunk_rows,
        approx_gelu=approx_gelu)

    out = pl.pallas_call(
        kernel,
        out_shape=jax.ShapeDtypeStruct((bt, tile_batch, num_classes),
                                       jnp.float32),
        grid=(bt, L),
        in_specs=in_specs,
        out_specs=pl.BlockSpec((None, tile_batch, num_classes),
                               lambda i, l: (i, 0, 0)),
        scratch_shapes=[pltpu.VMEM((tile_batch * P, C), jnp.float32)],
        compiler_params=pltpu.CompilerParams(
            dimension_semantics=("parallel", "arbitrary"),
            vmem_limit_bytes=_vmem_limit_bytes(),
        ),
    )(patches, params["embed_w"], params["embed_b"], *layer_args,
      params["norm_g"], params["norm_b"], params["cls_w"], params["cls_b"])

    return out.reshape(B, num_classes)


# ---------------------------------------------------------------------------
if __name__ == "__main__":
    # Small config consistent with MLPMixer's constructor semantics.
    # (Note: realistic perf needs C/CH/TH/P as multiples of 128; this demo is
    # intentionally tiny.)
    batch = 2
    channels = 3
    image_size = 16
    patch_size = 4
    num_layers = 2
    hidden_dim = 32
    tokens_hidden_dim = 16
    channels_hidden_dim = 64
    num_classes = 10
    num_patches = (image_size // patch_size) ** 2  # 16

    key = jax.random.PRNGKey(0)
    k_x, k_p = jax.random.split(key)
    x = jax.random.normal(k_x, (batch, channels, image_size, image_size),
                          dtype=jnp.float32)

    params = init_params(
        k_p,
        channels=channels,
        patch_size=patch_size,
        hidden_dim=hidden_dim,
        num_patches=num_patches,
        tokens_hidden_dim=tokens_hidden_dim,
        channels_hidden_dim=channels_hidden_dim,
        num_layers=num_layers,
        num_classes=num_classes,
    )

    fwd = jax.jit(functools.partial(
        mlp_mixer_forward,
        patch_size=patch_size,
        num_patches=num_patches,
        hidden_dim=hidden_dim,
        # tile_batch=None -> auto: bt == #TensorCores (1 on v5e/v6e, 2 on v7x)
    ))
    out = fwd(x, params)
    jax.block_until_ready(out)
    assert out.shape == (batch, num_classes), out.shape
    print("KERNEL_OK")
</pallas_src>

<mosaic_0001>
module attributes {stable_mosaic.version = 11 : i64} {
  func.func @_mixer_fused_kernel(%arg0: i32, %arg1: i32, %arg2: memref<1x32x48xbf16, #tpu.memory_space<vmem>>, %arg3: memref<48x32xbf16, #tpu.memory_space<vmem>>, %arg4: memref<1x32xf32, #tpu.memory_space<vmem>>, %arg5: memref<1x6x64xf32, #tpu.memory_space<vmem>>, %arg6: memref<1x16x16xbf16, #tpu.memory_space<vmem>>, %arg7: memref<1x16x1xf32, #tpu.memory_space<vmem>>, %arg8: memref<1x16x16xbf16, #tpu.memory_space<vmem>>, %arg9: memref<1x16x1xf32, #tpu.memory_space<vmem>>, %arg10: memref<1x32x64xbf16, #tpu.memory_space<vmem>>, %arg11: memref<1x64x32xbf16, #tpu.memory_space<vmem>>, %arg12: memref<1x32xf32, #tpu.memory_space<vmem>>, %arg13: memref<1x32xf32, #tpu.memory_space<vmem>>, %arg14: memref<32x10xbf16, #tpu.memory_space<vmem>>, %arg15: memref<1x10xf32, #tpu.memory_space<vmem>>, %arg16: memref<1x2x10xf32, #tpu.memory_space<vmem>>, %arg17: memref<32x32xf32, #tpu.memory_space<vmem>>) attributes {dimension_semantics = [#tpu.dimension_semantics<parallel>, #tpu.dimension_semantics<arbitrary>], iteration_bounds = array<i64: 1, 2>, scalar_prefetch = 0 : i64, scratch_operands = 1 : i64, tpu.core_type = #tpu.core_type<tc>, window_params = [{transform_indices = @transform_0, window_bounds = array<i64: 1, 32, 48>}, {pipeline_mode = #tpu.pipeline_mode<synchronous>, transform_indices = @transform_1, window_bounds = array<i64: 48, 32>}, {pipeline_mode = #tpu.pipeline_mode<synchronous>, transform_indices = @transform_2, window_bounds = array<i64: 1, 32>}, {transform_indices = @transform_3, window_bounds = array<i64: 1, 6, 64>}, {transform_indices = @transform_4, window_bounds = array<i64: 1, 16, 16>}, {transform_indices = @transform_5, window_bounds = array<i64: 1, 16, 1>}, {transform_indices = @transform_6, window_bounds = array<i64: 1, 16, 16>}, {transform_indices = @transform_7, window_bounds = array<i64: 1, 16, 1>}, {transform_indices = @transform_8, window_bounds = array<i64: 1, 32, 64>}, {transform_indices = @transform_9, window_bounds = array<i64: 1, 64, 32>}, {pipeline_mode = #tpu.pipeline_mode<synchronous>, transform_indices = @transform_10, window_bounds = array<i64: 1, 32>}, {pipeline_mode = #tpu.pipeline_mode<synchronous>, transform_indices = @transform_11, window_bounds = array<i64: 1, 32>}, {pipeline_mode = #tpu.pipeline_mode<synchronous>, transform_indices = @transform_12, window_bounds = array<i64: 32, 10>}, {pipeline_mode = #tpu.pipeline_mode<synchronous>, transform_indices = @transform_13, window_bounds = array<i64: 1, 10>}, {transform_indices = @transform_14, window_bounds = array<i64: 1, 2, 10>}]} {
    %c0_i32 = arith.constant 0 : i32
    %0 = arith.cmpi eq, %arg1, %c0_i32 : i32
    %1 = arith.extui %0 : i1 to i32
    %c0_i32_0 = arith.constant 0 : i32
    %2 = arith.cmpi ne, %1, %c0_i32_0 : i32
    scf.if %2 {
      %c0_68 = arith.constant 0 : index
      %c0_69 = arith.constant 0 : index
      %c0_70 = arith.constant 0 : index
      %148 = vector.load %arg2[%c0_68, %c0_69, %c0_70] : memref<1x32x48xbf16, #tpu.memory_space<vmem>>, vector<1x32x48xbf16>
      %149 = vector.shape_cast %148 : vector<1x32x48xbf16> to vector<32x48xbf16>
      %c0_71 = arith.constant 0 : index
      %c0_72 = arith.constant 0 : index
      %150 = vector.load %arg3[%c0_71, %c0_72] : memref<48x32xbf16, #tpu.memory_space<vmem>>, vector<48x32xbf16>
      %cst_73 = arith.constant dense<0.000000e+00> : vector<32x32xf32>
      %151 = tpu.matmul %149, %150, %cst_73 {dimension_numbers = #tpu.dot_dimension_numbers<[1], [0], [0], [1], [0, 0, 1, 1], [], []>} : vector<32x48xbf16>, vector<48x32xbf16>, vector<32x32xf32> -> vector<32x32xf32>
      %c0_74 = arith.constant 0 : index
      %c0_75 = arith.constant 0 : index
      %152 = vector.load %arg4[%c0_74, %c0_75] : memref<1x32xf32, #tpu.memory_space<vmem>>, vector<1x32xf32>
      %153 = vector.broadcast %152 : vector<1x32xf32> to vector<32x32xf32>
      %154 = arith.addf %151, %153 : vector<32x32xf32>
      %c0_76 = arith.constant 0 : index
      %c0_77 = arith.constant 0 : index
      %155 = vector.load %arg17[%c0_76, %c0_77] : memref<32x32xf32, #tpu.memory_space<vmem>>, vector<32x32xf32>
      tpu.vector_store %arg17[%c0_76, %c0_77], %154 {strides = array<i32>} : memref<32x32xf32, #tpu.memory_space<vmem>>, vector<32x32xf32>,
    } else {
    }
    %c0 = arith.constant 0 : index
    %c0_1 = arith.constant 0 : index
    %3 = vector.load %arg17[%c0, %c0_1] : memref<32x32xf32, #tpu.memory_space<vmem>>, vector<32x32xf32>
    %c0_2 = arith.constant 0 : index
    %c0_3 = arith.constant 0 : index
    %c0_4 = arith.constant 0 : index
    %4 = vector.load %arg5[%c0_2, %c0_3, %c0_4] : memref<1x6x64xf32, #tpu.memory_space<vmem>>, vector<1x1x32xf32>
    %5 = vector.shape_cast %4 : vector<1x1x32xf32> to vector<1x32xf32>
    %c0_5 = arith.constant 0 : index
    %c1 = arith.constant 1 : index
    %c0_6 = arith.constant 0 : index
    %6 = vector.load %arg5[%c0_5, %c1, %c0_6] : memref<1x6x64xf32, #tpu.memory_space<vmem>>, vector<1x1x32xf32>
    %7 = vector.shape_cast %6 : vector<1x1x32xf32> to vector<1x32xf32>
    %cst = arith.constant dense<0.000000e+00> : vector<32xf32>
    %8 = vector.multi_reduction <add>, %3, %cst [1] : vector<32x32xf32> to vector<32xf32>
    %9 = vector.shape_cast %8 : vector<32xf32> to vector<32x1xf32>
    %cst_7 = arith.constant 3.200000e+01 : f32
    %10 = vector.broadcast %cst_7 : f32 to vector<32x1xf32>
    %11 = arith.divf %9, %10 : vector<32x1xf32>
    %12 = arith.mulf %3, %3 : vector<32x32xf32>
    %cst_8 = arith.constant dense<0.000000e+00> : vector<32xf32>
    %13 = vector.multi_reduction <add>, %12, %cst_8 [1] : vector<32x32xf32> to vector<32xf32>
    %14 = vector.shape_cast %13 : vector<32xf32> to vector<32x1xf32>
    %cst_9 = arith.constant 3.200000e+01 : f32
    %15 = vector.broadcast %cst_9 : f32 to vector<32x1xf32>
    %16 = arith.divf %14, %15 : vector<32x1xf32>
    %17 = arith.mulf %11, %11 : vector<32x1xf32>
    %18 = arith.subf %16, %17 : vector<32x1xf32>
    %19 = vector.broadcast %11 : vector<32x1xf32> to vector<32x32xf32>
    %20 = arith.subf %3, %19 : vector<32x32xf32>
    %cst_10 = arith.constant 9.99999974E-6 : f32
    %21 = vector.broadcast %cst_10 : f32 to vector<32x1xf32>
    %22 = arith.addf %18, %21 : vector<32x1xf32>
    %23 = math.rsqrt %22 : vector<32x1xf32>
    %24 = vector.broadcast %23 : vector<32x1xf32> to vector<32x32xf32>
    %25 = arith.mulf %20, %24 : vector<32x32xf32>
    %26 = vector.broadcast %5 : vector<1x32xf32> to vector<32x32xf32>
    %27 = arith.mulf %25, %26 : vector<32x32xf32>
    %28 = vector.broadcast %7 : vector<1x32xf32> to vector<32x32xf32>
    %29 = arith.addf %27, %28 : vector<32x32xf32>
    %30 = arith.truncf %29 : vector<32x32xf32> to vector<32x32xbf16>
    %c0_11 = arith.constant 0 : index
    %c0_12 = arith.constant 0 : index
    %c0_13 = arith.constant 0 : index
    %31 = vector.load %arg6[%c0_11, %c0_12, %c0_13] : memref<1x16x16xbf16, #tpu.memory_space<vmem>>, vector<1x16x16xbf16>
    %32 = vector.shape_cast %31 : vector<1x16x16xbf16> to vector<16x16xbf16>
    %c0_14 = arith.constant 0 : index
    %c0_15 = arith.constant 0 : index
    %c0_16 = arith.constant 0 : index
    %33 = vector.load %arg8[%c0_14, %c0_15, %c0_16] : memref<1x16x16xbf16, #tpu.memory_space<vmem>>, vector<1x16x16xbf16>
    %34 = vector.shape_cast %33 : vector<1x16x16xbf16> to vector<16x16xbf16>
    %c0_17 = arith.constant 0 : index
    %c0_18 = arith.constant 0 : index
    %c0_19 = arith.constant 0 : index
    %35 = vector.load %arg7[%c0_17, %c0_18, %c0_19] : memref<1x16x1xf32, #tpu.memory_space<vmem>>, vector<1x16x1xf32>
    %36 = vector.shape_cast %35 : vector<1x16x1xf32> to vector<16x1xf32>
    %c0_20 = arith.constant 0 : index
    %c0_21 = arith.constant 0 : index
    %c0_22 = arith.constant 0 : index
    %37 = vector.load %arg9[%c0_20, %c0_21, %c0_22] : memref<1x16x1xf32, #tpu.memory_space<vmem>>, vector<1x16x1xf32>
    %38 = vector.shape_cast %37 : vector<1x16x1xf32> to vector<16x1xf32>
    %39 = vector.extract_strided_slice %30 {offsets = [0, 0], sizes = [16, 32], strides = [1, 1]} : vector<32x32xbf16> to vector<16x32xbf16>
    %cst_23 = arith.constant dense<0.000000e+00> : vector<16x32xf32>
    %40 = tpu.matmul %32, %39, %cst_23 {dimension_numbers = #tpu.dot_dimension_numbers<[1], [0], [0], [1], [0, 0, 1, 1], [], []>} : vector<16x16xbf16>, vector<16x32xbf16>, vector<16x32xf32> -> vector<16x32xf32>
    %41 = vector.broadcast %36 : vector<16x1xf32> to vector<16x32xf32>
    %42 = arith.addf %40, %41 : vector<16x32xf32>
    %43 = arith.mulf %42, %42 : vector<16x32xf32>
    %44 = arith.mulf %42, %43 : vector<16x32xf32>
    %cst_24 = arith.constant 4.471500e-02 : f32
    %45 = vector.broadcast %cst_24 : f32 to vector<16x32xf32>
    %46 = arith.mulf %45, %44 : vector<16x32xf32>
    %47 = arith.addf %42, %46 : vector<16x32xf32>
    %cst_25 = arith.constant 0.797884583 : f32
    %48 = vector.broadcast %cst_25 : f32 to vector<16x32xf32>
    %49 = arith.mulf %48, %47 : vector<16x32xf32>
    %50 = math.tanh %49 : vector<16x32xf32>
    %cst_26 = arith.constant 1.000000e+00 : f32
    %51 = vector.broadcast %cst_26 : f32 to vector<16x32xf32>
    %52 = arith.addf %51, %50 : vector<16x32xf32>
    %cst_27 = arith.constant 5.000000e-01 : f32
    %53 = vector.broadcast %cst_27 : f32 to vector<16x32xf32>
    %54 = arith.mulf %53, %52 : vector<16x32xf32>
    %55 = arith.mulf %42, %54 : vector<16x32xf32>
    %56 = arith.truncf %55 : vector<16x32xf32> to vector<16x32xbf16>
    %cst_28 = arith.constant dense<0.000000e+00> : vector<16x32xf32>
    %57 = tpu.matmul %34, %56, %cst_28 {dimension_numbers = #tpu.dot_dimension_numbers<[1], [0], [0], [1], [0, 0, 1, 1], [], []>} : vector<16x16xbf16>, vector<16x32xbf16>, vector<16x32xf32> -> vector<16x32xf32>
    %58 = vector.broadcast %38 : vector<16x1xf32> to vector<16x32xf32>
    %59 = arith.addf %57, %58 : vector<16x32xf32>
    %60 = vector.extract_strided_slice %3 {offsets = [0, 0], sizes = [16, 32], strides = [1, 1]} : vector<32x32xf32> to vector<16x32xf32>
    %61 = arith.addf %60, %59 : vector<16x32xf32>
    %c0_29 = arith.constant 0 : index
    %c0_30 = arith.constant 0 : index
    %62 = vector.load %arg17[%c0_29, %c0_30] : memref<32x32xf32, #tpu.memory_space<vmem>>, vector<16x32xf32>
    tpu.vector_store %arg17[%c0_29, %c0_30], %61 {strides = array<i32>} : memref<32x32xf32, #tpu.memory_space<vmem>>, vector<16x32xf32>,
    %63 = vector.extract_strided_slice %30 {offsets = [16, 0], sizes = [16, 32], strides = [1, 1]} : vector<32x32xbf16> to vector<16x32xbf16>
    %cst_31 = arith.constant dense<0.000000e+00> : vector<16x32xf32>
    %64 = tpu.matmul %32, %63, %cst_31 {dimension_numbers = #tpu.dot_dimension_numbers<[1], [0], [0], [1], [0, 0, 1, 1], [], []>} : vector<16x16xbf16>, vector<16x32xbf16>, vector<16x32xf32> -> vector<16x32xf32>
    %65 = vector.broadcast %36 : vector<16x1xf32> to vector<16x32xf32>
    %66 = arith.addf %64, %65 : vector<16x32xf32>
    %67 = arith.mulf %66, %66 : vector<16x32xf32>
    %68 = arith.mulf %66, %67 : vector<16x32xf32>
    %cst_32 = arith.constant 4.471500e-02 : f32
    %69 = vector.broadcast %cst_32 : f32 to vector<16x32xf32>
    %70 = arith.mulf %69, %68 : vector<16x32xf32>
    %71 = arith.addf %66, %70 : vector<16x32xf32>
    %cst_33 = arith.constant 0.797884583 : f32
    %72 = vector.broadcast %cst_33 : f32 to vector<16x32xf32>
    %73 = arith.mulf %72, %71 : vector<16x32xf32>
    %74 = math.tanh %73 : vector<16x32xf32>
    %cst_34 = arith.constant 1.000000e+00 : f32
    %75 = vector.broadcast %cst_34 : f32 to vector<16x32xf32>
    %76 = arith.addf %75, %74 : vector<16x32xf32>
    %cst_35 = arith.constant 5.000000e-01 : f32
    %77 = vector.broadcast %cst_35 : f32 to vector<16x32xf32>
    %78 = arith.mulf %77, %76 : vector<16x32xf32>
    %79 = arith.mulf %66, %78 : vector<16x32xf32>
    %80 = arith.truncf %79 : vector<16x32xf32> to vector<16x32xbf16>
    %cst_36 = arith.constant dense<0.000000e+00> : vector<16x32xf32>
    %81 = tpu.matmul %34, %80, %cst_36 {dimension_numbers = #tpu.dot_dimension_numbers<[1], [0], [0], [1], [0, 0, 1, 1], [], []>} : vector<16x16xbf16>, vector<16x32xbf16>, vector<16x32xf32> -> vector<16x32xf32>
    %82 = vector.broadcast %38 : vector<16x1xf32> to vector<16x32xf32>
    %83 = arith.addf %81, %82 : vector<16x32xf32>
    %84 = vector.extract_strided_slice %3 {offsets = [16, 0], sizes = [16, 32], strides = [1, 1]} : vector<32x32xf32> to vector<16x32xf32>
    %85 = arith.addf %84, %83 : vector<16x32xf32>
    %c16 = arith.constant 16 : index
    %c0_37 = arith.constant 0 : index
    %86 = vector.load %arg17[%c16, %c0_37] : memref<32x32xf32, #tpu.memory_space<vmem>>, vector<16x32xf32>
    tpu.vector_store %arg17[%c16, %c0_37], %85 {strides = array<i32>} : memref<32x32xf32, #tpu.memory_space<vmem>>, vector<16x32xf32>,
    %c0_38 = arith.constant 0 : index
    %c0_39 = arith.constant 0 : index
    %87 = vector.load %arg17[%c0_38, %c0_39] : memref<32x32xf32, #tpu.memory_space<vmem>>, vector<32x32xf32>
    %c0_40 = arith.constant 0 : index
    %c2 = arith.constant 2 : index
    %c0_41 = arith.constant 0 : index
    %88 = vector.load %arg5[%c0_40, %c2, %c0_41] : memref<1x6x64xf32, #tpu.memory_space<vmem>>, vector<1x1x32xf32>
    %89 = vector.shape_cast %88 : vector<1x1x32xf32> to vector<1x32xf32>
    %c0_42 = arith.constant 0 : index
    %c3 = arith.constant 3 : index
    %c0_43 = arith.constant 0 : index
    %90 = vector.load %arg5[%c0_42, %c3, %c0_43] : memref<1x6x64xf32, #tpu.memory_space<vmem>>, vector<1x1x32xf32>
    %91 = vector.shape_cast %90 : vector<1x1x32xf32> to vector<1x32xf32>
    %c0_44 = arith.constant 0 : index
    %c4 = arith.constant 4 : index
    %c0_45 = arith.constant 0 : index
    %92 = vector.load %arg5[%c0_44, %c4, %c0_45] : memref<1x6x64xf32, #tpu.memory_space<vmem>>, vector<1x1x64xf32>
    %93 = vector.shape_cast %92 : vector<1x1x64xf32> to vector<1x64xf32>
    %c0_46 = arith.constant 0 : index
    %c5 = arith.constant 5 : index
    %c0_47 = arith.constant 0 : index
    %94 = vector.load %arg5[%c0_46, %c5, %c0_47] : memref<1x6x64xf32, #tpu.memory_space<vmem>>, vector<1x1x32xf32>
    %95 = vector.shape_cast %94 : vector<1x1x32xf32> to vector<1x32xf32>
    %cst_48 = arith.constant dense<0.000000e+00> : vector<32xf32>
    %96 = vector.multi_reduction <add>, %87, %cst_48 [1] : vector<32x32xf32> to vector<32xf32>
    %97 = vector.shape_cast %96 : vector<32xf32> to vector<32x1xf32>
    %cst_49 = arith.constant 3.200000e+01 : f32
    %98 = vector.broadcast %cst_49 : f32 to vector<32x1xf32>
    %99 = arith.divf %97, %98 : vector<32x1xf32>
    %100 = arith.mulf %87, %87 : vector<32x32xf32>
    %cst_50 = arith.constant dense<0.000000e+00> : vector<32xf32>
    %101 = vector.multi_reduction <add>, %100, %cst_50 [1] : vector<32x32xf32> to vector<32xf32>
    %102 = vector.shape_cast %101 : vector<32xf32> to vector<32x1xf32>
    %cst_51 = arith.constant 3.200000e+01 : f32
    %103 = vector.broadcast %cst_51 : f32 to vector<32x1xf32>
    %104 = arith.divf %102, %103 : vector<32x1xf32>
    %105 = arith.mulf %99, %99 : vector<32x1xf32>
    %106 = arith.subf %104, %105 : vector<32x1xf32>
    %107 = vector.broadcast %99 : vector<32x1xf32> to vector<32x32xf32>
    %108 = arith.subf %87, %107 : vector<32x32xf32>
    %cst_52 = arith.constant 9.99999974E-6 : f32
    %109 = vector.broadcast %cst_52 : f32 to vector<32x1xf32>
    %110 = arith.addf %106, %109 : vector<32x1xf32>
    %111 = math.rsqrt %110 : vector<32x1xf32>
    %112 = vector.broadcast %111 : vector<32x1xf32> to vector<32x32xf32>
    %113 = arith.mulf %108, %112 : vector<32x32xf32>
    %114 = vector.broadcast %89 : vector<1x32xf32> to vector<32x32xf32>
    %115 = arith.mulf %113, %114 : vector<32x32xf32>
    %116 = vector.broadcast %91 : vector<1x32xf32> to vector<32x32xf32>
    %117 = arith.addf %115, %116 : vector<32x32xf32>
    %118 = arith.truncf %117 : vector<32x32xf32> to vector<32x32xbf16>
    %c0_53 = arith.constant 0 : index
    %c0_54 = arith.constant 0 : index
    %c0_55 = arith.constant 0 : index
    %119 = vector.load %arg10[%c0_53, %c0_54, %c0_55] : memref<1x32x64xbf16, #tpu.memory_space<vmem>>, vector<1x32x64xbf16>
    %120 = vector.shape_cast %119 : vector<1x32x64xbf16> to vector<32x64xbf16>
    %c0_56 = arith.constant 0 : index
    %c0_57 = arith.constant 0 : index
    %c0_58 = arith.constant 0 : index
    %121 = vector.load %arg11[%c0_56, %c0_57, %c0_58] : memref<1x64x32xbf16, #tpu.memory_space<vmem>>, vector<1x64x32xbf16>
    %122 = vector.shape_cast %121 : vector<1x64x32xbf16> to vector<64x32xbf16>
    %cst_59 = arith.constant dense<0.000000e+00> : vector<32x64xf32>
    %123 = tpu.matmul %118, %120, %cst_59 {dimension_numbers = #tpu.dot_dimension_numbers<[1], [0], [0], [1], [0, 0, 1, 1], [], []>} : vector<32x32xbf16>, vector<32x64xbf16>, vector<32x64xf32> -> vector<32x64xf32>
    %124 = vector.broadcast %93 : vector<1x64xf32> to vector<32x64xf32>
    %125 = arith.addf %123, %124 : vector<32x64xf32>
    %126 = arith.mulf %125, %125 : vector<32x64xf32>
    %127 = arith.mulf %125, %126 : vector<32x64xf32>
    %cst_60 = arith.constant 4.471500e-02 : f32
    %128 = vector.broadcast %cst_60 : f32 to vector<32x64xf32>
    %129 = arith.mulf %128, %127 : vector<32x64xf32>
    %130 = arith.addf %125, %129 : vector<32x64xf32>
    %cst_61 = arith.constant 0.797884583 : f32
    %131 = vector.broadcast %cst_61 : f32 to vector<32x64xf32>
    %132 = arith.mulf %131, %130 : vector<32x64xf32>
    %133 = math.tanh %132 : vector<32x64xf32>
    %cst_62 = arith.constant 1.000000e+00 : f32
    %134 = vector.broadcast %cst_62 : f32 to vector<32x64xf32>
    %135 = arith.addf %134, %133 : vector<32x64xf32>
    %cst_63 = arith.constant 5.000000e-01 : f32
    %136 = vector.broadcast %cst_63 : f32 to vector<32x64xf32>
    %137 = arith.mulf %136, %135 : vector<32x64xf32>
    %138 = arith.mulf %125, %137 : vector<32x64xf32>
    %139 = arith.truncf %138 : vector<32x64xf32> to vector<32x64xbf16>
    %cst_64 = arith.constant dense<0.000000e+00> : vector<32x32xf32>
    %140 = tpu.matmul %139, %122, %cst_64 {dimension_numbers = #tpu.dot_dimension_numbers<[1], [0], [0], [1], [0, 0, 1, 1], [], []>} : vector<32x64xbf16>, vector<64x32xbf16>, vector<32x32xf32> -> vector<32x32xf32>
    %141 = vector.broadcast %95 : vector<1x32xf32> to vector<32x32xf32>
    %142 = arith.addf %140, %141 : vector<32x32xf32>
    %143 = arith.addf %87, %142 : vector<32x32xf32>
    %c0_65 = arith.constant 0 : index
    %c0_66 = arith.constant 0 : index
    %144 = vector.load %arg17[%c0_65, %c0_66] : memref<32x32xf32, #tpu.memory_space<vmem>>, vector<32x32xf32>
    tpu.vector_store %arg17[%c0_65, %c0_66], %143 {strides = array<i32>} : memref<32x32xf32, #tpu.memory_space<vmem>>, vector<32x32xf32>,
    %c1_i32 = arith.constant 1 : i32
    %145 = arith.cmpi eq, %arg1, %c1_i32 : i32
    %146 = arith.extui %145 : i1 to i32
    %c0_i32_67 = arith.constant 0 : i32
    %147 = arith.cmpi ne, %146, %c0_i32_67 : i32
    scf.if %147 {
      %c0_68 = arith.constant 0 : index
      %c0_69 = arith.constant 0 : index
      %148 = vector.load %arg12[%c0_68, %c0_69] : memref<1x32xf32, #tpu.memory_space<vmem>>, vector<1x32xf32>
      %c0_70 = arith.constant 0 : index
      %c0_71 = arith.constant 0 : index
      %149 = vector.load %arg13[%c0_70, %c0_71] : memref<1x32xf32, #tpu.memory_space<vmem>>, vector<1x32xf32>
      %cst_72 = arith.constant dense<0.000000e+00> : vector<32xf32>
      %150 = vector.multi_reduction <add>, %143, %cst_72 [1] : vector<32x32xf32> to vector<32xf32>
      %151 = vector.shape_cast %150 : vector<32xf32> to vector<32x1xf32>
      %cst_73 = arith.constant 3.200000e+01 : f32
      %152 = vector.broadcast %cst_73 : f32 to vector<32x1xf32>
      %153 = arith.divf %151, %152 : vector<32x1xf32>
      %154 = arith.mulf %143, %143 : vector<32x32xf32>
      %cst_74 = arith.constant dense<0.000000e+00> : vector<32xf32>
      %155 = vector.multi_reduction <add>, %154, %cst_74 [1] : vector<32x32xf32> to vector<32xf32>
      %156 = vector.shape_cast %155 : vector<32xf32> to vector<32x1xf32>
      %cst_75 = arith.constant 3.200000e+01 : f32
      %157 = vector.broadcast %cst_75 : f32 to vector<32x1xf32>
      %158 = arith.divf %156, %157 : vector<32x1xf32>
      %159 = arith.mulf %153, %153 : vector<32x1xf32>
      %160 = arith.subf %158, %159 : vector<32x1xf32>
      %161 = vector.broadcast %153 : vector<32x1xf32> to vector<32x32xf32>
      %162 = arith.subf %143, %161 : vector<32x32xf32>
      %cst_76 = arith.constant 9.99999974E-6 : f32
      %163 = vector.broadcast %cst_76 : f32 to vector<32x1xf32>
      %164 = arith.addf %160, %163 : vector<32x1xf32>
      %165 = math.rsqrt %164 : vector<32x1xf32>
      %166 = vector.broadcast %165 : vector<32x1xf32> to vector<32x32xf32>
      %167 = arith.mulf %162, %166 : vector<32x32xf32>
      %168 = vector.broadcast %148 : vector<1x32xf32> to vector<32x32xf32>
      %169 = arith.mulf %167, %168 : vector<32x32xf32>
      %170 = vector.broadcast %149 : vector<1x32xf32> to vector<32x32xf32>
      %171 = arith.addf %169, %170 : vector<32x32xf32>
      %172 = vector.extract_strided_slice %171 {offsets = [0, 0], sizes = [16, 32], strides = [1, 1]} : vector<32x32xf32> to vector<16x32xf32>
      %cst_77 = arith.constant dense<0.000000e+00> : vector<32xf32>
      %173 = vector.multi_reduction <add>, %172, %cst_77 [0] : vector<16x32xf32> to vector<32xf32>
      %174 = vector.shape_cast %173 : vector<32xf32> to vector<1x32xf32>
      %cst_78 = arith.constant 1.600000e+01 : f32
      %175 = vector.broadcast %cst_78 : f32 to vector<1x32xf32>
      %176 = arith.divf %174, %175 : vector<1x32xf32>
      %177 = vector.extract_strided_slice %171 {offsets = [16, 0], sizes = [16, 32], strides = [1, 1]} : vector<32x32xf32> to vector<16x32xf32>
      %cst_79 = arith.constant dense<0.000000e+00> : vector<32xf32>
      %178 = vector.multi_reduction <add>, %177, %cst_79 [0] : vector<16x32xf32> to vector<32xf32>
      %179 = vector.shape_cast %178 : vector<32xf32> to vector<1x32xf32>
      %cst_80 = arith.constant 1.600000e+01 : f32
      %180 = vector.broadcast %cst_80 : f32 to vector<1x32xf32>
      %181 = arith.divf %179, %180 : vector<1x32xf32>
      %182 = tpu.concatenate %176, %181 in 0 : vector<1x32xf32>, vector<1x32xf32> -> vector<2x32xf32>
      %183 = arith.truncf %182 : vector<2x32xf32> to vector<2x32xbf16>
      %c0_81 = arith.constant 0 : index
      %c0_82 = arith.constant 0 : index
      %184 = vector.load %arg14[%c0_81, %c0_82] : memref<32x10xbf16, #tpu.memory_space<vmem>>, vector<32x10xbf16>
      %cst_83 = arith.constant dense<0.000000e+00> : vector<2x10xf32>
      %185 = tpu.matmul %183, %184, %cst_83 {dimension_numbers = #tpu.dot_dimension_numbers<[1], [0], [0], [1], [0, 0, 1, 1], [], []>} : vector<2x32xbf16>, vector<32x10xbf16>, vector<2x10xf32> -> vector<2x10xf32>
      %c0_84 = arith.constant 0 : index
      %c0_85 = arith.constant 0 : index
      %186 = vector.load %arg15[%c0_84, %c0_85] : memref<1x10xf32, #tpu.memory_space<vmem>>, vector<1x10xf32>
      %187 = vector.broadcast %186 : vector<1x10xf32> to vector<2x10xf32>
      %188 = arith.addf %185, %187 : vector<2x10xf32>
      %c0_86 = arith.constant 0 : index
      %c0_87 = arith.constant 0 : index
      %c0_88 = arith.constant 0 : index
      %189 = vector.load %arg16[%c0_86, %c0_87, %c0_88] : memref<1x2x10xf32, #tpu.memory_space<vmem>>, vector<1x2x10xf32>
      %190 = vector.shape_cast %189 : vector<1x2x10xf32> to vector<2x10xf32>
      %191 = vector.shape_cast %188 : vector<2x10xf32> to vector<1x2x10xf32>
      tpu.vector_store %arg16[%c0_86, %c0_87, %c0_88], %191 {strides = array<i32>} : memref<1x2x10xf32, #tpu.memory_space<vmem>>, vector<1x2x10xf32>,
    } else {
    }
    return
  }
  func.func @transform_0(%arg0: i32, %arg1: i32) -> (i32, i32, i32) {
    %c0_i32 = arith.constant 0 : i32
    %c0_i32_0 = arith.constant 0 : i32
    %c0_i32_1 = arith.constant 0 : i32
    return %arg0, %c0_i32, %c0_i32_0 : i32, i32, i32
  }
  func.func @transform_1(%arg0: i32, %arg1: i32) -> (i32, i32) {
    %c0_i32 = arith.constant 0 : i32
    %c0_i32_0 = arith.constant 0 : i32
    %c0_i32_1 = arith.constant 0 : i32
    return %c0_i32, %c0_i32_0 : i32, i32
  }
  func.func @transform_2(%arg0: i32, %arg1: i32) -> (i32, i32) {
    %c0_i32 = arith.constant 0 : i32
    %c0_i32_0 = arith.constant 0 : i32
    %c0_i32_1 = arith.constant 0 : i32
    return %c0_i32, %c0_i32_0 : i32, i32
  }
  func.func @transform_3(%arg0: i32, %arg1: i32) -> (i32, i32, i32) {
    %c0_i32 = arith.constant 0 : i32
    %c0_i32_0 = arith.constant 0 : i32
    %c0_i32_1 = arith.constant 0 : i32
    return %arg1, %c0_i32, %c0_i32_0 : i32, i32, i32
  }
  func.func @transform_4(%arg0: i32, %arg1: i32) -> (i32, i32, i32) {
    %c0_i32 = arith.constant 0 : i32
    %c0_i32_0 = arith.constant 0 : i32
    %c0_i32_1 = arith.constant 0 : i32
    return %arg1, %c0_i32, %c0_i32_0 : i32, i32, i32
  }
  func.func @transform_5(%arg0: i32, %arg1: i32) -> (i32, i32, i32) {
    %c0_i32 = arith.constant 0 : i32
    %c0_i32_0 = arith.constant 0 : i32
    %c0_i32_1 = arith.constant 0 : i32
    return %arg1, %c0_i32, %c0_i32_0 : i32, i32, i32
  }
  func.func @transform_6(%arg0: i32, %arg1: i32) -> (i32, i32, i32) {
    %c0_i32 = arith.constant 0 : i32
    %c0_i32_0 = arith.constant 0 : i32
    %c0_i32_1 = arith.constant 0 : i32
    return %arg1, %c0_i32, %c0_i32_0 : i32, i32, i32
  }
  func.func @transform_7(%arg0: i32, %arg1: i32) -> (i32, i32, i32) {
    %c0_i32 = arith.constant 0 : i32
    %c0_i32_0 = arith.constant 0 : i32
    %c0_i32_1 = arith.constant 0 : i32
    return %arg1, %c0_i32, %c0_i32_0 : i32, i32, i32
  }
  func.func @transform_8(%arg0: i32, %arg1: i32) -> (i32, i32, i32) {
    %c0_i32 = arith.constant 0 : i32
    %c0_i32_0 = arith.constant 0 : i32
    %c0_i32_1 = arith.constant 0 : i32
    return %arg1, %c0_i32, %c0_i32_0 : i32, i32, i32
  }
  func.func @transform_9(%arg0: i32, %arg1: i32) -> (i32, i32, i32) {
    %c0_i32 = arith.constant 0 : i32
    %c0_i32_0 = arith.constant 0 : i32
    %c0_i32_1 = arith.constant 0 : i32
    return %arg1, %c0_i32, %c0_i32_0 : i32, i32, i32
  }
  func.func @transform_10(%arg0: i32, %arg1: i32) -> (i32, i32) {
    %c0_i32 = arith.constant 0 : i32
    %c0_i32_0 = arith.constant 0 : i32
    %c0_i32_1 = arith.constant 0 : i32
    return %c0_i32, %c0_i32_0 : i32, i32
  }
  func.func @transform_11(%arg0: i32, %arg1: i32) -> (i32, i32) {
    %c0_i32 = arith.constant 0 : i32
    %c0_i32_0 = arith.constant 0 : i32
    %c0_i32_1 = arith.constant 0 : i32
    return %c0_i32, %c0_i32_0 : i32, i32
  }
  func.func @transform_12(%arg0: i32, %arg1: i32) -> (i32, i32) {
    %c0_i32 = arith.constant 0 : i32
    %c0_i32_0 = arith.constant 0 : i32
    %c0_i32_1 = arith.constant 0 : i32
    return %c0_i32, %c0_i32_0 : i32, i32
  }
  func.func @transform_13(%arg0: i32, %arg1: i32) -> (i32, i32) {
    %c0_i32 = arith.constant 0 : i32
    %c0_i32_0 = arith.constant 0 : i32
    %c0_i32_1 = arith.constant 0 : i32
    return %c0_i32, %c0_i32_0 : i32, i32
  }
  func.func @transform_14(%arg0: i32, %arg1: i32) -> (i32, i32, i32) {
    %c0_i32 = arith.constant 0 : i32
    %c0_i32_0 = arith.constant 0 : i32
    %c0_i32_1 = arith.constant 0 : i32
    return %arg0, %c0_i32, %c0_i32_0 : i32, i32, i32
  }
}

</mosaic_0001>

<bundles_post_ra>
// kernel: mlp_mixer_forward.1
= control target key start
LH: loop header
LB: loop body
LE: loop exit
PB: predicated region body
PF: predicated region fallthrough
CT: control target
= control target key end

     0   :  { %s2242_s0 = inlined_call_operand.vmem [shape: bf16[1,32,48], index: 0, kind: input, shape index: {}]   ;;  %s2243_s1 = inlined_call_operand.vmem [shape: bf16[48,32], index: 1, kind: input, shape index: {}]   ;;  %s2244_s2 = inlined_call_operand.vmem [shape: f32[1,32], index: 2, kind: input, shape index: {}]   ;;  %s2245_s3 = inlined_call_operand.vmem [shape: f32[2,6,64], index: 3, kind: input, shape index: {}]   ;;  %s2246_s4 = inlined_call_operand.vmem [shape: bf16[2,16,16], index: 4, kind: input, shape index: {}]   ;;  %s2247_s5 = inlined_call_operand.vmem [shape: f32[2,16,1], index: 5, kind: input, shape index: {}]   ;;  %s2248_s6 = inlined_call_operand.vmem [shape: bf16[2,16,16], index: 6, kind: input, shape index: {}]   ;;  %s2249_s7 = inlined_call_operand.vmem [shape: f32[2,16,1], index: 7, kind: input, shape index: {}]   ;;  %s2250_s8 = inlined_call_operand.vmem [shape: bf16[2,32,64], index: 8, kind: input, shape index: {}]   ;;  %s2251_s9 = inlined_call_operand.vmem [shape: bf16[2,64,32], index: 9, kind: input, shape index: {}]   ;;  %s2252_s10 = inlined_call_operand.vmem [shape: f32[1,32], index: 10, kind: input, shape index: {}]   ;;  %s2253_s11 = inlined_call_operand.vmem [shape: f32[1,32], index: 11, kind: input, shape index: {}]   ;;  %s2254_s12 = inlined_call_operand.vmem [shape: bf16[32,10], index: 12, kind: input, shape index: {}]   ;;  %s2255_s13 = inlined_call_operand.vmem [shape: f32[1,10], index: 13, kind: input, shape index: {}]   ;;  %s2256_s14 = inlined_call_operand.hbm [shape: f32[1,2,10], index: 14, kind: output, shape index: {}]  }
   0x1   :  { %2259 = sst [smem:[#allocation9_spill]] %s2245_s3 }
   0x2   :  { %2260 = sst [smem:[#allocation10_spill]] %s2253_s11 }
   0x3   :  { %2261 = sst [smem:[#allocation11_spill]] %s2255_s13 }
   0x4   :  { %2262 = sst [smem:[#allocation12_spill]] %s2256_s14 }
   0x5   :  { %19 = vsyncpa [#allocation4], 0  ;;  %s1915_s29 = smov 0   ;;  %s1917_s30 = smov 0  }
   0x6   :  { %s1919_s15 = smov 0  }
   0x7 LB: > { %2263 = sst [smem:[#allocation6_spill]] %s1830_s30  ;;  %s34_s17 = sadd.s32 1, %s1830_s30  ;;  %s1834_s15 = sphi %s1919_s15, %s25_s15   ;;  %s1830_s30 = sphi %s1917_s30, %s2275_s30   ;;  %s1826_s29 = sphi %s1915_s29, %s2274_s29  }
   0x8   : > { %2264 = sst [smem:[#allocation7_spill]] %s1834_s15  ;;  %p35_p0 = scmp.ge.s32.totalorder %s34_s17, 2 }
   0x9   : > { %p1568_p1 = scmp.ge.s32.totalorder %s1834_s15, 1  ;;  %p494_p2 = scmp.lt.s32.totalorder %s1834_s15, 3 }
   0xa   : > { %s2277_s17 = smov (%p35_p0, %s34_s17), 0 }
   0xb   : > { %2265 = sst [smem:[#allocation8_spill]] %s2277_s17  ;;  %p495_p3 = pnand %p1568_p1, %p494_p2 }
   0xc   : > { %p574_p4 = scmp.lt.s32.totalorder (!%p495_p3), %s1826_s29, 1  ;;  %s2266_s3 = sld [smem:[#allocation9_spill]] (!%p495_p3) }
   0xd   : > { %498 = sbr.rel (%p495_p3) target bundleno = 1465 (0x5b9), region = 76  ;;  %p1582_p5 = scmp.ne.s32.totalorder (!%p495_p3), %s1826_s29, 0 }
  0x12   : > { %s575_s18 = scalar_select %p574_p4, %s1826_s29, 1 }
  0x14   : > { %s1938_s19 = sshll.u32 %s575_s18, 3  ;;  %s1660_s20 = sshll.u32 %s575_s18, 4 }
  0x15   : > { %s1944_s23 = scalar_lea.vmem %s2266_s3, %s1938_s19  ;;  %s1953_s16 = scalar_lea.vmem %s2247_s5, %s1660_s20 }
  0x16   : > { %s592_s14 = scalar_lea.vmem %s2248_s6, %s1938_s19  ;;  %s1962_s11 = scalar_lea.vmem %s2249_s7, %s1660_s20 }
  0x17   : > { %s1967_s3 = scalar_lea.vmem %s2250_s8, %s1660_s20  ;;  %s1664_s24 = sshll.u32 %s575_s18, 5 }
  0x18   : > { %s1972_s27 = scalar_lea.vmem %s2251_s9, %s1664_s24  ;;  %612 = sbr.rel (%p1582_p5) target bundleno = 179 (0xb3), region = 80 }
  0x1d   : > { %v1669_v0 = vld [vmem:[%s2243_s1 + $0x10] sm:$0xff]  ;;  %v1668_v1 = vld [vmem:[%s2243_s1 + $0x8] sm:$0xff]  ;;  %v1667_v2 = vld [vmem:[%s2243_s1] sm:$0xff]  ;;  %vm655_vm0 = vcmask 392192   ;;  %vm681_vm1 = vcmask 261120  }
  0x1e   : > { %667 = vmatpush.bf16.msra.mxu0 %v1669_v0  ;;  %1680 = vmatpush.bf16.msra.mxu1 %v1669_v0  ;;  %v1665_v3 = vld [vmem:[%s2242_s0] sm:$0xff]  ;;  %v1666_v4 = vld [vmem:[%s2242_s0 + $0x8] sm:$0xff] }
  0x1f   : > { %v1723_v5 = vld [vmem:[%s2244_s2] ss:$0 sm:$0xff] }
  0x22   : > { %668 = vmatpush.bf16.msra.mxu0 %v1668_v1  ;;  %1681 = vmatpush.bf16.msra.mxu1 %v1668_v1 }
  0x26   : > { %669 = vmatpush.bf16.msra.mxu0 %v1667_v2  ;;  %1682 = vmatpush.bf16.msra.mxu1 %v1667_v2 }
  0x29   : > { %1603 = vmatmul.msk.bf16.vlgmr.msra.gmra.mxu0 %vm655_vm0, %v1665_v3  ;;  %1604 = vmatmul.msk.bf16.vlgmr.msra.gmra.mxu1 %vm655_vm0, %v1666_v4 }
  0xa6   : > { %v671_v6 = vpop.f32.mrf.mxu0  ;;  %v676_v7 = vpop.f32.mrf.mxu1 }
  0xa7   : > { %v672_v8 = vadd.f32 %v1723_v5, %v671_v6  ;;  %v677_v9 = vadd.f32 %v1723_v5, %v676_v7 }
  0xa9   : > { %682 = vst.msk [vmem:[#allocation2] sm:$0xff] %vm681_vm1, %v672_v8 }
  0xaa   : > { %684 = vst.msk [vmem:[#allocation2 + $0x10] sm:$0xff] %vm681_vm1, %v677_v9 }
  0xae   : > { %v673_v10 = vpop.f32.mrf.mxu0  ;;  %v678_v11 = vpop.f32.mrf.mxu1 }
  0xaf   : > { %v674_v12 = vadd.f32 %v1723_v5, %v673_v10  ;;  %v679_v13 = vadd.f32 %v1723_v5, %v678_v11 }
  0xb1   : > { %683 = vst.msk [vmem:[#allocation2 + $0x8] sm:$0xff] %vm681_vm1, %v674_v12 }
  0xb2   : > { %685 = vst.msk [vmem:[#allocation2 + $0x18] sm:$0xff] %vm681_vm1, %v679_v13 }
  0xb3 PF: > { %v1993_v14 = vld [vmem:[#allocation2 + $0x10] sm:$0xff]  ;;  %vm692_vm2 = vcmask 261120   ;;  %v1995_v15 = vld [vmem:[#allocation2] sm:$0xff]  ;;  %v1836_v30 = vmov 32.0   ;;  %v815_v12 = vld [vmem:[%s1953_s16 + $0x8] sm:$0xff]  ;;  %s2267_s17 = scalar_lea.vmem %s2246_s4, %s1938_s19  ;;  %vm839_vm0 = vcmask 130048  }
  0xb4   : > { %v699_v16 = vsel %vm692_vm2, %v1993_v14, 0.0  ;;  %v718_v17 = vmul.f32 %v1993_v14, %v1993_v14  ;;  %v693_v18 = vsel %vm692_vm2, %v1995_v15, 0.0  ;;  %v716_v26 = vmul.f32 %v1995_v15, %v1995_v15  ;;  %v814_v13 = vld [vmem:[%s1953_s16] sm:$0xff]  ;;  %p1645_p6 = scmp.ne.s32.totalorder %s1826_s29, 1 }
  0xb5   : > { %700 = vadd.xlane.f32.xlu0 %v699_v16  ;;  %694 = vadd.xlane.f32.xlu2 %v693_v18  ;;  %1733 = vrcp.f32 %v1836_v30  ;;  %v1837_v18 = vmov 0   ;;  %s2268_s20 = sld [smem:[#allocation10_spill]] (!%p1645_p6) }
  0xb6   : > { %v726_v20 = vsel %vm692_vm2, %v718_v17, 0.0  ;;  %v720_v28 = vsel %vm692_vm2, %v716_v26, 0.0  ;;  %v1727_v17 = vld [vmem:[%s1944_s23] ss:$0 sm:$0xff]  ;;  %1725 = vset.pattern.permute.xlu0 %v1837_v18  ;;  %1724 = vset.pattern.permute.xlu2 %v1837_v18  ;;  %s2269_s21 = sld [smem:[#allocation11_spill]] (!%p1645_p6) }
  0xb7   : > { %727 = vadd.xlane.f32.xlu1 %v726_v20 }
  0xb8   : > { %v2006_v21 = vld [vmem:[#allocation2 + $0x8] sm:$0xff]  ;;  %1726 = vset.pattern.permute.xlu1 %v1837_v18 }
  0xb9   : > { %v2003_v19 = vld [vmem:[#allocation2 + $0x18] sm:$0xff]  ;;  %v696_v24 = vsel %vm692_vm2, %v2006_v21, 0.0  ;;  %v717_v27 = vmul.f32 %v2006_v21, %v2006_v21 }
  0xba   : > { %v719_v22 = vmul.f32 %v2003_v19, %v2003_v19  ;;  %v702_v23 = vsel %vm692_vm2, %v2003_v19, 0.0 }
  0xbb   : > { %v723_v29 = vsel %vm692_vm2, %v717_v27, 0.0  ;;  %v1734_v31 = vpop.eup %1733  ;;  %v1728_v27 = vld [vmem:[%s1944_s23 + $0x1] ss:$0 sm:$0xff] }
  0xbc   : > { %v729_v25 = vsel %vm692_vm2, %v719_v22, 0.0  ;;  %v706_v32 = vmul.f32 32.0, %v1734_v31  ;;  %vm710_vm3 = vweird.f32 %v1734_v31 }
  0xbd   : > { %703 = vadd.xlane.f32.xlu0 %v702_v23  ;;  %697 = vadd.xlane.f32.xlu2 %v696_v24 }
  0xbe   : > { %v707_v33 = vsub.f32 1.0, %v706_v32  ;;  %v817_v32 = vld [vmem:[%s1962_s11 + $0x8] sm:$0xff] }
  0xbf   : > { %730 = vadd.xlane.f32.xlu1 %v729_v25 }
  0xc0   : > { %v708_v34 = vmul.f32 %v1734_v31, %v707_v33 }
  0xc2   : > { %v709_v35 = vadd.f32 %v1734_v31, %v708_v34 }
  0xc4   : > { %v2021_v36 = vsel %vm710_vm3, %v1734_v31, %v709_v35 }
  0xc5   : > { %721 = vadd.xlane.f32.xlu0 %v720_v28 }
  0xc7   : > { %724 = vadd.xlane.f32.xlu1 %v723_v29 }
  0xd5   : > { %820 = vperm.xlu2 %1724, %v814_v13  }
  0xd9   : > { %825 = vperm.xlu0 %1725, %v815_v12  }
  0xdd   : > { %883 = vperm.xlu2 %1724, %v817_v32  }
 0x128   : > { %v701_v37 = vpop.xlane.xlu0 %700  ;;  %v695_v38 = vpop.xlane.xlu2 %694 }
 0x129   : > { %v714_v39 = vmul.f32 %v2021_v36, %v701_v37  ;;  %v2031_v50 = vmul.f32 %v2021_v36, %v695_v38 }
 0x12a   : > { %v728_v40 = vpop.xlane.xlu1 %727 }
 0x12b   : > { %v738_v41 = vmul.f32 %v714_v39, %v714_v39  ;;  %v734_v42 = vmul.f32 %v728_v40, %v2021_v36  ;;  %v736_v55 = vmul.f32 %v2031_v50, %v2031_v50  ;;  %v746_v9 = vsub.f32 %v1993_v14, %v714_v39 }
 0x12d   : > { %v742_v43 = vsub.f32 %v734_v42, %v738_v41 }
 0x12f   : > { %v750_v44 = vadd.f32 1e-05, %v742_v43 }
 0x130   : > { %v704_v45 = vpop.xlane.xlu0 %703  ;;  %v698_v48 = vpop.xlane.xlu2 %697 }
 0x131   : > { %1735 = vrsqrt.f32 %v750_v44  ;;  %v2026_v46 = vmul.f32 %v2021_v36, %v704_v45  ;;  %v2035_v53 = vmul.f32 %v2021_v36, %v698_v48  ;;  %vm778_vm5 = vweird.f32 %v750_v44 }
 0x132   : > { %v731_v47 = vpop.xlane.xlu1 %730 }
 0x133   : > { %v739_v49 = vmul.f32 %v2026_v46, %v2026_v46  ;;  %v735_v51 = vmul.f32 %v731_v47, %v2021_v36  ;;  %v737_v60 = vmul.f32 %v2035_v53, %v2035_v53  ;;  %v747_v31 = vsub.f32 %v2003_v19, %v2026_v46 }
 0x135   : > { %v743_v52 = vsub.f32 %v735_v51, %v739_v49  ;;  %v745_v49 = vsub.f32 %v2006_v21, %v2035_v53 }
 0x137   : > { %v1736_v54 = vpop.eup %1735  ;;  %v751_v56 = vadd.f32 1e-05, %v743_v52 }
 0x138   : > { %v773_v57 = vmul.f32 %v1736_v54, %v750_v44  ;;  %v722_v58 = vpop.xlane.xlu0 %721  ;;  %vm779_vm4 = vweird.f32 %v1736_v54  ;;  %v744_v44 = vsub.f32 %v1995_v15, %v2031_v50  ;;  %v1670_v50 = vld [vmem:[%s2267_s17] sm:$0xff] }
 0x139   : > { %1737 = vrsqrt.f32 %v751_v56  ;;  %v732_v59 = vmul.f32 %v722_v58, %v2021_v36  ;;  %vm780_vm6 = vmor %vm778_vm5, %vm779_vm4  ;;  %vm788_vm8 = vweird.f32 %v751_v56 }
 0x13a   : > { %v774_v61 = vmul.f32 %v1736_v54, %v773_v57  ;;  %v725_v62 = vpop.xlane.xlu1 %724 }
 0x13b   : > { %v740_v63 = vsub.f32 %v732_v59, %v736_v55  ;;  %v733_v0 = vmul.f32 %v725_v62, %v2021_v36 }
 0x13c   : > { %v775_v1 = vmul.f32 0.5, %v774_v61 }
 0x13d   : > { %v748_v2 = vadd.f32 1e-05, %v740_v63  ;;  %v741_v3 = vsub.f32 %v733_v0, %v737_v60 }
 0x13e   : > { %v776_v4 = vsub.f32 1.5, %v775_v1 }
 0x13f   : > { %v1738_v5 = vpop.eup %1737  ;;  %1739 = vrsqrt.f32 %v748_v2  ;;  %v749_v6 = vadd.f32 1e-05, %v741_v3  ;;  %vm758_vm10 = vweird.f32 %v748_v2  ;;  %v821_v3 = vpop.permute.xlu2 %820 }
 0x140   : > { %v783_v7 = vmul.f32 %v1738_v5, %v751_v56  ;;  %v777_v8 = vmul.f32 %v1736_v54, %v776_v4  ;;  %vm789_vm7 = vweird.f32 %v1738_v5 }
 0x141   : > { %1741 = vrsqrt.f32 %v749_v6  ;;  %vm790_vm9 = vmor %vm788_vm8, %vm789_vm7  ;;  %vm768_vm12 = vweird.f32 %v749_v6 }
 0x142   : > { %v784_v10 = vmul.f32 %v1738_v5, %v783_v7  ;;  %v781_v11 = vsel %vm780_vm6, %v1736_v54, %v777_v8 }
 0x143   : > { %v794_v16 = vmul.f32 %v781_v11, %v746_v9 }
 0x144   : > { %v785_v20 = vmul.f32 0.5, %v784_v10 }
 0x145   : > { %v1740_v22 = vpop.eup %1739  ;;  %v799_v26 = vmul.f32 %v1727_v17, %v794_v16 }
 0x146   : > { %v786_v23 = vsub.f32 1.5, %v785_v20  ;;  %v753_v24 = vmul.f32 %v1740_v22, %v748_v2  ;;  %vm759_vm11 = vweird.f32 %v1740_v22 }
 0x147   : > { %v1742_v25 = vpop.eup %1741  ;;  %v804_v38 = vadd.f32 %v1728_v27, %v799_v26  ;;  %vm760_vm14 = vmor %vm758_vm10, %vm759_vm11 }
 0x148   : > { %v754_v28 = vmul.f32 %v1740_v22, %v753_v24  ;;  %v763_v29 = vmul.f32 %v1742_v25, %v749_v6  ;;  %v787_v30 = vmul.f32 %v1738_v5, %v786_v23  ;;  %vm769_vm13 = vweird.f32 %v1742_v25 }
 0x149   : > { %vm770_vm15 = vmor %vm768_vm12, %vm769_vm13  ;;  %v808_v46 = vpack.c.bf16 %v804_v38, %v804_v38 }
 0x14a   : > { %v755_v33 = vmul.f32 0.5, %v754_v28  ;;  %v764_v34 = vmul.f32 %v1742_v25, %v763_v29  ;;  %v791_v35 = vsel %vm790_vm9, %v1738_v5, %v787_v30 }
 0x14b   : > { %v795_v37 = vmul.f32 %v791_v35, %v747_v31  ;;  %v914_v55 = vunpack.c.l.b16 %v808_v46  ;;  %v826_v11 = vpop.permute.xlu0 %825 }
 0x14c   : > { %v756_v39 = vsub.f32 1.5, %v755_v33  ;;  %v765_v40 = vmul.f32 0.5, %v764_v34 }
 0x14d   : > { %v800_v41 = vmul.f32 %v1727_v17, %v795_v37 }
 0x14e   : > { %v766_v42 = vsub.f32 1.5, %v765_v40  ;;  %v757_v43 = vmul.f32 %v1740_v22, %v756_v39 }
 0x14f   : > { %v805_v45 = vadd.f32 %v1728_v27, %v800_v41 }
 0x150   : > { %v761_v47 = vsel %vm760_vm14, %v1740_v22, %v757_v43  ;;  %v767_v48 = vmul.f32 %v1742_v25, %v766_v42  ;;  %v816_v22 = vld [vmem:[%s1962_s11] sm:$0xff]  ;;  %vm1198_vm14 = vcmask 523264  }
 0x151   : > { %v809_v51 = vpack.c.bf16 %v805_v45, %v805_v45  ;;  %v792_v52 = vmul.f32 %v761_v47, %v744_v44  ;;  %878 = vperm.xlu1 %1726, %v816_v22  }
 0x152   : > { %v771_v54 = vsel %vm770_vm15, %v1742_v25, %v767_v48 }
 0x153   : > { %v915_v56 = vunpack.c.l.b16 %v809_v51  ;;  %v793_v57 = vmul.f32 %v771_v54, %v745_v49  ;;  %v797_v58 = vmul.f32 %v1727_v17, %v792_v52 }
 0x155   : > { %v916_v59 = vpack.c.b16 %v915_v56, %v914_v55  ;;  %v798_v60 = vmul.f32 %v1727_v17, %v793_v57  ;;  %v802_v61 = vadd.f32 %v1728_v27, %v797_v58  ;;  %v1671_v58 = vld [vmem:[%s592_s14] sm:$0xff] }
 0x157   : > { %925 = vmatpush.bf16.msra.mxu2 %v916_v59  ;;  %v803_v62 = vadd.f32 %v1728_v27, %v798_v60  ;;  %v806_v63 = vpack.c.bf16 %v802_v61, %v802_v61 }
 0x159   : > { %v807_v53 = vpack.c.bf16 %v803_v62, %v803_v62  ;;  %v835_v0 = vunpack.c.l.b16 %v806_v63 }
 0x15a   : > { %1615 = vmatmul.msk.bf16.vlgmr.msra.gmra.mxu2 %vm839_vm0, %v1670_v50 }
 0x15b   : > { %v836_v1 = vunpack.c.l.b16 %v807_v53 }
 0x15d   : > { %v837_v2 = vpack.c.b16 %v836_v1, %v835_v0  ;;  %v884_v1 = vpop.permute.xlu2 %883 }
 0x15f   : > { %850 = vmatpush.bf16.msra.mxu0 %v837_v2 }
 0x162   : > { %1609 = vmatmul.msk.bf16.vlgmr.msra.gmra.mxu0 %vm839_vm0, %v1670_v50 }
 0x1c3   : > { %v879_v61 = vpop.permute.xlu1 %878 }
 0x1dd   : > { %v927_v4 = vpop.f32.mrf.mxu2 }
 0x1de   : > { %v928_v5 = vadd.f32 %v927_v4, %v821_v3 }
 0x1df   : > { %v852_v6 = vpop.f32.mrf.mxu0 }
 0x1e0   : > { %v932_v7 = vmul.f32 %v928_v5, %v928_v5  ;;  %v853_v8 = vadd.f32 %v852_v6, %v821_v3 }
 0x1e2   : > { %v857_v9 = vmul.f32 %v853_v8, %v853_v8  ;;  %v934_v10 = vmul.f32 %v932_v7, %v928_v5 }
 0x1e4   : > { %v859_v12 = vmul.f32 %v857_v9, %v853_v8  ;;  %v936_v13 = vmul.f32 0.044715, %v934_v10 }
 0x1e5   : > { %v929_v16 = vpop.f32.mrf.mxu2 }
 0x1e6   : > { %v861_v17 = vmul.f32 0.044715, %v859_v12  ;;  %v930_v18 = vadd.f32 %v929_v16, %v826_v11  ;;  %v938_v20 = vadd.f32 %v936_v13, %v928_v5 }
 0x1e7   : > { %v854_v23 = vpop.f32.mrf.mxu0 }
 0x1e8   : > { %v933_v24 = vmul.f32 %v930_v18, %v930_v18  ;;  %v855_v25 = vadd.f32 %v854_v23, %v826_v11  ;;  %v940_v26 = vmul.f32 0.7978846, %v938_v20  ;;  %v863_v27 = vadd.f32 %v861_v17, %v853_v8 }
 0x1ea   : > { %v858_v28 = vmul.f32 %v855_v25, %v855_v25  ;;  %v935_v29 = vmul.f32 %v933_v24, %v930_v18  ;;  %v865_v30 = vmul.f32 0.7978846, %v863_v27  ;;  %1743 = vtanh.f32 %v940_v26  ;;  %v1673_v27 = vld [vmem:[%s1967_s3 + $0x8] sm:$0xff] }
 0x1eb   : > { %1683 = vmatpush.bf16.msrb.mxu2 %v1673_v27  ;;  %1122 = vmatpush.bf16.msrb.mxu0 %v1673_v27 }
 0x1ec   : > { %v860_v31 = vmul.f32 %v858_v28, %v855_v25  ;;  %v937_v32 = vmul.f32 0.044715, %v935_v29  ;;  %1745 = vtanh.f32 %v865_v30 }
 0x1ee   : > { %v862_v33 = vmul.f32 0.044715, %v860_v31  ;;  %v939_v34 = vadd.f32 %v937_v32, %v930_v18  ;;  %v1672_v31 = vld [vmem:[%s1967_s3] sm:$0xff] }
 0x1ef   : > { %1684 = vmatpush.bf16.msrb.mxu2 %v1672_v31  ;;  %1123 = vmatpush.bf16.msrb.mxu0 %v1672_v31 }
 0x1f0   : > { %v941_v35 = vmul.f32 0.7978846, %v939_v34  ;;  %v864_v37 = vadd.f32 %v862_v33, %v855_v25  ;;  %v1744_v38 = vpop.eup %1743 }
 0x1f1   : > { %v944_v41 = vadd.f32 1.0, %v1744_v38 }
 0x1f2   : > { %1747 = vtanh.f32 %v941_v35  ;;  %v866_v39 = vmul.f32 0.7978846, %v864_v37  ;;  %v1746_v40 = vpop.eup %1745 }
 0x1f3   : > { %v869_v42 = vadd.f32 1.0, %v1746_v40  ;;  %v946_v45 = vmul.f32 0.5, %v944_v41 }
 0x1f4   : > { %1749 = vtanh.f32 %v866_v39 }
 0x1f5   : > { %v871_v49 = vmul.f32 0.5, %v869_v42  ;;  %v948_v51 = vmul.f32 %v946_v45, %v928_v5 }
 0x1f7   : > { %v873_v56 = vmul.f32 %v871_v49, %v853_v8 }
 0x1f8   : > { %v1748_v43 = vpop.eup %1747 }
 0x1f9   : > { %v945_v44 = vadd.f32 1.0, %v1748_v43 }
 0x1fa   : > { %v1750_v46 = vpop.eup %1749 }
 0x1fb   : > { %v947_v47 = vmul.f32 0.5, %v945_v44  ;;  %v870_v48 = vadd.f32 1.0, %v1750_v46 }
 0x1fd   : > { %v949_v52 = vmul.f32 %v947_v47, %v930_v18  ;;  %v872_v54 = vmul.f32 0.5, %v870_v48 }
 0x1ff   : > { %v950_v55 = vpack.c.bf16 %v949_v52, %v948_v51  ;;  %v874_v57 = vmul.f32 %v872_v54, %v855_v25 }
 0x201   : > { %958 = vmatpush.bf16.msra.mxu3 %v950_v55  ;;  %v875_v59 = vpack.c.bf16 %v874_v57, %v873_v56 }
 0x203   : > { %901 = vmatpush.bf16.msra.mxu1 %v875_v59 }
 0x204   : > { %1616 = vmatmul.msk.bf16.vlgmr.msra.gmra.mxu3 %vm839_vm0, %v1671_v58 }
 0x206   : > { %1614 = vmatmul.msk.bf16.vlgmr.msra.gmra.mxu1 %vm839_vm0, %v1671_v58 }
 0x283   : > { %v903_v60 = vpop.f32.mrf.mxu1 }
 0x284   : > { %v904_v50 = vadd.f32 %v903_v60, %v879_v61 }
 0x286   : > { %v908_v62 = vadd.f32 %v904_v50, %v1995_v15 }
 0x287   : > { %v960_v63 = vpop.f32.mrf.mxu3 }
 0x288   : > { %910 = vst.msk [vmem:[#allocation2] sm:$0xff] %vm692_vm2, %v908_v62  ;;  %v961_v53 = vadd.f32 %v960_v63, %v879_v61 }
 0x28a   : > { %v965_v0 = vadd.f32 %v961_v53, %v1993_v14 }
 0x28b   : > { %v905_v2 = vpop.f32.mrf.mxu1 }
 0x28c   : > { %967 = vst.msk [vmem:[#allocation2 + $0x10] sm:$0xff] %vm692_vm2, %v965_v0  ;;  %v906_v3 = vadd.f32 %v905_v2, %v884_v1 }
 0x28e   : > { %v909_v4 = vadd.f32 %v906_v3, %v2006_v21 }
 0x28f   : > { %v962_v5 = vpop.f32.mrf.mxu3  ;;  %v2092_v12 = vld [vmem:[#allocation2] sm:$0xff] }
 0x290   : > { %911 = vst.msk [vmem:[#allocation2 + $0x8] sm:$0xff] %vm692_vm2, %v909_v4  ;;  %v963_v6 = vadd.f32 %v962_v5, %v884_v1  ;;  %v977_v16 = vsel %vm692_vm2, %v2092_v12, 0.0  ;;  %v993_v18 = vmul.f32 %v2092_v12, %v2092_v12  ;;  %v1729_v5 = vld [vmem:[%s1944_s23 + $0x2] ss:$0 sm:$0xff] }
 0x292   : > { %v966_v7 = vadd.f32 %v963_v6, %v2003_v19  ;;  %v997_v22 = vsel %vm692_vm2, %v993_v18, 0.0 }
 0x293   : > { %v2077_v15 = vld [vmem:[#allocation2 + $0x10] sm:$0xff] }
 0x294   : > { %968 = vst.msk [vmem:[#allocation2 + $0x18] sm:$0xff] %vm692_vm2, %v966_v7  ;;  %v983_v14 = vsel %vm692_vm2, %v2077_v15, 0.0  ;;  %v995_v8 = vmul.f32 %v2077_v15, %v2077_v15 }
 0x295   : > { %984 = vadd.xlane.f32.xlu2 %v983_v14 }
 0x296   : > { %v1003_v9 = vsel %vm692_vm2, %v995_v8, 0.0 }
 0x297   : > { %1004 = vadd.xlane.f32.xlu0 %v1003_v9  ;;  %v2094_v13 = vld [vmem:[#allocation2 + $0x8] sm:$0xff] }
 0x298   : > { %v980_v17 = vsel %vm692_vm2, %v2094_v13, 0.0  ;;  %v994_v20 = vmul.f32 %v2094_v13, %v2094_v13 }
 0x29a   : > { %v1000_v23 = vsel %vm692_vm2, %v994_v20, 0.0 }
 0x29b   : > { %v2085_v21 = vld [vmem:[#allocation2 + $0x18] sm:$0xff] }
 0x29c   : > { %v986_v10 = vsel %vm692_vm2, %v2085_v21, 0.0  ;;  %v996_v19 = vmul.f32 %v2085_v21, %v2085_v21 }
 0x29d   : > { %987 = vadd.xlane.f32.xlu1 %v986_v10  ;;  %v1730_v10 = vld [vmem:[%s1944_s23 + $0x3] ss:$0 sm:$0xff] }
 0x29e   : > { %v1006_v11 = vsel %vm692_vm2, %v996_v19, 0.0 }
 0x29f   : > { %1007 = vadd.xlane.f32.xlu2 %v1006_v11 }
 0x2a5   : > { %978 = vadd.xlane.f32.xlu1 %v977_v16 }
 0x2a7   : > { %981 = vadd.xlane.f32.xlu2 %v980_v17 }
 0x2ad   : > { %998 = vadd.xlane.f32.xlu1 %v997_v22 }
 0x2af   : > { %1001 = vadd.xlane.f32.xlu2 %v1000_v23 }
 0x308   : > { %v985_v24 = vpop.xlane.xlu2 %984 }
 0x309   : > { %v991_v25 = vmul.f32 %v985_v24, %v2021_v36 }
 0x30a   : > { %v1005_v26 = vpop.xlane.xlu0 %1004 }
 0x30b   : > { %v1015_v28 = vmul.f32 %v991_v25, %v991_v25  ;;  %v1011_v29 = vmul.f32 %v1005_v26, %v2021_v36  ;;  %v1023_v53 = vsub.f32 %v2077_v15, %v991_v25 }
 0x30d   : > { %v1019_v30 = vsub.f32 %v1011_v29, %v1015_v28 }
 0x30f   : > { %v1027_v32 = vadd.f32 1e-05, %v1019_v30 }
 0x310   : > { %v988_v33 = vpop.xlane.xlu1 %987 }
 0x311   : > { %1751 = vrsqrt.f32 %v1027_v32  ;;  %v992_v34 = vmul.f32 %v988_v33, %v2021_v36  ;;  %vm1055_vm3 = vweird.f32 %v1027_v32 }
 0x312   : > { %v1008_v35 = vpop.xlane.xlu2 %1007 }
 0x313   : > { %v1016_v37 = vmul.f32 %v992_v34, %v992_v34  ;;  %v1012_v38 = vmul.f32 %v1008_v35, %v2021_v36  ;;  %v1024_v7 = vsub.f32 %v2085_v21, %v992_v34 }
 0x315   : > { %v1020_v39 = vsub.f32 %v1012_v38, %v1016_v37 }
 0x317   : > { %v1752_v40 = vpop.eup %1751  ;;  %v1028_v41 = vadd.f32 1e-05, %v1020_v39 }
 0x318   : > { %v1050_v42 = vmul.f32 %v1752_v40, %v1027_v32  ;;  %v979_v43 = vpop.xlane.xlu1 %978  ;;  %vm1056_vm1 = vweird.f32 %v1752_v40 }
 0x319   : > { %1753 = vrsqrt.f32 %v1028_v41  ;;  %v2113_v47 = vmul.f32 %v979_v43, %v2021_v36  ;;  %vm1057_vm4 = vmor %vm1055_vm3, %vm1056_vm1  ;;  %vm1065_vm6 = vweird.f32 %v1028_v41 }
 0x31a   : > { %v1051_v44 = vmul.f32 %v1752_v40, %v1050_v42  ;;  %v982_v45 = vpop.xlane.xlu2 %981 }
 0x31b   : > { %v2116_v51 = vmul.f32 %v982_v45, %v2021_v36  ;;  %v1013_v56 = vmul.f32 %v2113_v47, %v2113_v47  ;;  %v1021_v31 = vsub.f32 %v2092_v12, %v2113_v47  ;;  %v1676_v45 = vld [vmem:[%s1972_s27 + $0x10] sm:$0xff]  ;;  %v1731_v47 = vld [vmem:[%s1944_s23 + $0x4] ss:$0 sm:$0xff] }
 0x31c   : > { %v1052_v46 = vmul.f32 0.5, %v1051_v44  ;;  %v1677_v44 = vld [vmem:[%s1972_s27 + $0x18] sm:$0xff] }
 0x31d   : > { %v1014_v60 = vmul.f32 %v2116_v51, %v2116_v51  ;;  %v1022_v34 = vsub.f32 %v2094_v13, %v2116_v51  ;;  %1685 = vmatpush.bf16.msrb.mxu3 %v1677_v44  ;;  %1209 = vmatpush.bf16.msrb.mxu1 %v1677_v44 }
 0x31e   : > { %v1053_v48 = vsub.f32 1.5, %v1052_v46  ;;  %v1675_v46 = vld [vmem:[%s1972_s27 + $0x8] sm:$0xff] }
 0x31f   : > { %v1754_v49 = vpop.eup %1753 }
 0x320   : > { %v1054_v52 = vmul.f32 %v1752_v40, %v1053_v48  ;;  %v1060_v54 = vmul.f32 %v1754_v49, %v1028_v41  ;;  %v999_v55 = vpop.xlane.xlu1 %998  ;;  %vm1066_vm5 = vweird.f32 %v1754_v49  ;;  %v1674_v48 = vld [vmem:[%s1972_s27] sm:$0xff] }
 0x321   : > { %v1009_v57 = vmul.f32 %v999_v55, %v2021_v36  ;;  %vm1067_vm7 = vmor %vm1065_vm6, %vm1066_vm5  ;;  %1686 = vmatpush.bf16.msrb.mxu3 %v1676_v45  ;;  %1210 = vmatpush.bf16.msrb.mxu1 %v1676_v45 }
 0x322   : > { %v1061_v58 = vmul.f32 %v1754_v49, %v1060_v54  ;;  %v1002_v59 = vpop.xlane.xlu2 %1001  ;;  %v1058_v62 = vsel %vm1057_vm4, %v1752_v40, %v1054_v52 }
 0x323   : > { %v1017_v61 = vsub.f32 %v1009_v57, %v1013_v56  ;;  %v1010_v50 = vmul.f32 %v1002_v59, %v2021_v36  ;;  %v1071_v3 = vmul.f32 %v1058_v62, %v1023_v53 }
 0x324   : > { %v1062_v63 = vmul.f32 0.5, %v1061_v58 }
 0x325   : > { %v1025_v0 = vadd.f32 1e-05, %v1017_v61  ;;  %v1018_v1 = vsub.f32 %v1010_v50, %v1014_v60  ;;  %v1076_v9 = vmul.f32 %v1729_v5, %v1071_v3  ;;  %1687 = vmatpush.bf16.msrb.mxu3 %v1675_v46  ;;  %1211 = vmatpush.bf16.msrb.mxu1 %v1675_v46 }
 0x326   : > { %v1063_v2 = vsub.f32 1.5, %v1062_v63 }
 0x327   : > { %1755 = vrsqrt.f32 %v1025_v0  ;;  %v1026_v4 = vadd.f32 1e-05, %v1018_v1  ;;  %v1081_v18 = vadd.f32 %v1730_v10, %v1076_v9  ;;  %vm1035_vm9 = vweird.f32 %v1025_v0 }
 0x328   : > { %v1064_v6 = vmul.f32 %v1754_v49, %v1063_v2 }
 0x329   : > { %1757 = vrsqrt.f32 %v1026_v4  ;;  %vm1045_vm12 = vweird.f32 %v1026_v4  ;;  %1688 = vmatpush.bf16.msrb.mxu3 %v1674_v48  ;;  %1212 = vmatpush.bf16.msrb.mxu1 %v1674_v48 }
 0x32a   : > { %v1068_v14 = vsel %vm1067_vm7, %v1754_v49, %v1064_v6 }
 0x32b   : > { %v1072_v8 = vmul.f32 %v1068_v14, %v1024_v7 }
 0x32d   : > { %v1756_v19 = vpop.eup %1755  ;;  %v1077_v11 = vmul.f32 %v1729_v5, %v1072_v8 }
 0x32e   : > { %v1030_v16 = vmul.f32 %v1756_v19, %v1025_v0  ;;  %vm1036_vm8 = vweird.f32 %v1756_v19 }
 0x32f   : > { %v1758_v17 = vpop.eup %1757  ;;  %v1082_v20 = vadd.f32 %v1730_v10, %v1077_v11  ;;  %vm1037_vm11 = vmor %vm1035_vm9, %vm1036_vm8 }
 0x330   : > { %v1031_v22 = vmul.f32 %v1756_v19, %v1030_v16  ;;  %v1040_v23 = vmul.f32 %v1758_v17, %v1026_v4  ;;  %vm1046_vm10 = vweird.f32 %v1758_v17 }
 0x331   : > { %v1084_v24 = vpack.c.bf16 %v1082_v20, %v1081_v18  ;;  %vm1047_vm13 = vmor %vm1045_vm12, %vm1046_vm10 }
 0x332   : > { %v1032_v25 = vmul.f32 0.5, %v1031_v22  ;;  %v1041_v26 = vmul.f32 %v1758_v17, %v1040_v23 }
 0x333   : > { %1626 = vmatmul.msk.bf16.vlgmr.msrb.gmra.mxu2 %vm692_vm2, %v1084_v24 }
 0x334   : > { %v1033_v27 = vsub.f32 1.5, %v1032_v25  ;;  %v1042_v28 = vmul.f32 0.5, %v1041_v26 }
 0x336   : > { %v1034_v29 = vmul.f32 %v1756_v19, %v1033_v27  ;;  %v1043_v30 = vsub.f32 1.5, %v1042_v28 }
 0x338   : > { %v1038_v32 = vsel %vm1037_vm11, %v1756_v19, %v1034_v29  ;;  %v1044_v33 = vmul.f32 %v1758_v17, %v1043_v30 }
 0x339   : > { %v1069_v35 = vmul.f32 %v1038_v32, %v1021_v31 }
 0x33a   : > { %v1048_v37 = vsel %vm1047_vm13, %v1758_v17, %v1044_v33 }
 0x33b   : > { %v1070_v38 = vmul.f32 %v1048_v37, %v1022_v34  ;;  %v1074_v39 = vmul.f32 %v1729_v5, %v1069_v35  ;;  %v1732_v35 = vld [vmem:[%s1944_s23 + $0x5] ss:$0 sm:$0xff] }
 0x33d   : > { %v1075_v40 = vmul.f32 %v1729_v5, %v1070_v38  ;;  %v1079_v41 = vadd.f32 %v1730_v10, %v1074_v39 }
 0x33f   : > { %v1080_v42 = vadd.f32 %v1730_v10, %v1075_v40 }
 0x341   : > { %v1083_v43 = vpack.c.bf16 %v1080_v42, %v1079_v41 }
 0x343   : > { %1625 = vmatmul.msk.bf16.vlgmr.msrb.gmra.mxu0 %vm692_vm2, %v1083_v43 }
 0x3b6   : > { %v1130_v49 = vpop.f32.mrf.mxu2 }
 0x3b7   : > { %v1131_v51 = vadd.f32 %v1731_v47, %v1130_v49 }
 0x3b9   : > { %v1137_v52 = vmul.f32 %v1131_v51, %v1131_v51 }
 0x3bb   : > { %v1141_v54 = vmul.f32 %v1137_v52, %v1131_v51 }
 0x3bd   : > { %v1145_v55 = vmul.f32 0.044715, %v1141_v54 }
 0x3be   : > { %v1132_v56 = vpop.f32.mrf.mxu2 }
 0x3bf   : > { %v1149_v57 = vadd.f32 %v1145_v55, %v1131_v51  ;;  %v1133_v58 = vadd.f32 %v1731_v47, %v1132_v56 }
 0x3c0   : > { %v1125_v59 = vpop.f32.mrf.mxu0 }
 0x3c1   : > { %v1153_v60 = vmul.f32 0.7978846, %v1149_v57  ;;  %v1138_v61 = vmul.f32 %v1133_v58, %v1133_v58  ;;  %v1126_v50 = vadd.f32 %v1731_v47, %v1125_v59 }
 0x3c3   : > { %v1142_v62 = vmul.f32 %v1138_v61, %v1133_v58  ;;  %v1135_v63 = vmul.f32 %v1126_v50, %v1126_v50  ;;  %1759 = vtanh.f32 %v1153_v60 }
 0x3c5   : > { %v1146_v53 = vmul.f32 0.044715, %v1142_v62  ;;  %v1139_v0 = vmul.f32 %v1135_v63, %v1126_v50 }
 0x3c7   : > { %v1150_v1 = vadd.f32 %v1146_v53, %v1133_v58  ;;  %v1143_v2 = vmul.f32 0.044715, %v1139_v0 }
 0x3c8   : > { %v1127_v3 = vpop.f32.mrf.mxu0 }
 0x3c9   : > { %v1154_v4 = vmul.f32 0.7978846, %v1150_v1  ;;  %v1147_v5 = vadd.f32 %v1143_v2, %v1126_v50  ;;  %v1128_v6 = vadd.f32 %v1731_v47, %v1127_v3  ;;  %v1760_v7 = vpop.eup %1759 }
 0x3ca   : > { %v1161_v10 = vadd.f32 1.0, %v1760_v7 }
 0x3cb   : > { %1761 = vtanh.f32 %v1154_v4  ;;  %v1151_v14 = vmul.f32 0.7978846, %v1147_v5  ;;  %v1136_v8 = vmul.f32 %v1128_v6, %v1128_v6 }
 0x3cc   : > { %v1165_v17 = vmul.f32 0.5, %v1161_v10 }
 0x3cd   : > { %v1140_v9 = vmul.f32 %v1136_v8, %v1128_v6  ;;  %1763 = vtanh.f32 %v1151_v14 }
 0x3ce   : > { %v1169_v24 = vmul.f32 %v1165_v17, %v1131_v51 }
 0x3cf   : > { %v1144_v19 = vmul.f32 0.044715, %v1140_v9 }
 0x3d1   : > { %v1762_v11 = vpop.eup %1761  ;;  %v1148_v16 = vadd.f32 %v1144_v19, %v1128_v6 }
 0x3d2   : > { %v1162_v18 = vadd.f32 1.0, %v1762_v11 }
 0x3d3   : > { %v1152_v20 = vmul.f32 0.7978846, %v1148_v16  ;;  %v1764_v23 = vpop.eup %1763 }
 0x3d4   : > { %v1166_v22 = vmul.f32 0.5, %v1162_v18  ;;  %v1159_v26 = vadd.f32 1.0, %v1764_v23 }
 0x3d5   : > { %1765 = vtanh.f32 %v1152_v20 }
 0x3d6   : > { %v1170_v25 = vmul.f32 %v1166_v22, %v1133_v58  ;;  %v1163_v29 = vmul.f32 0.5, %v1159_v26 }
 0x3d8   : > { %v1172_v27 = vpack.c.bf16 %v1170_v25, %v1169_v24  ;;  %v1167_v32 = vmul.f32 %v1163_v29, %v1126_v50 }
 0x3da   : > { %1644 = vmatmul.msk.bf16.vlgmr.msrb.gmra.mxu3 %vm1198_vm14, %v1172_v27 }
 0x3db   : > { %v1766_v28 = vpop.eup %1765 }
 0x3dc   : > { %v1160_v30 = vadd.f32 1.0, %v1766_v28 }
 0x3de   : > { %v1164_v31 = vmul.f32 0.5, %v1160_v30 }
 0x3e0   : > { %v1168_v33 = vmul.f32 %v1164_v31, %v1128_v6 }
 0x3e2   : > { %v1171_v34 = vpack.c.bf16 %v1168_v33, %v1167_v32 }
 0x3e4   : > { %1643 = vmatmul.msk.bf16.vlgmr.msrb.gmra.mxu1 %vm1198_vm14, %v1171_v34 }
 0x45d   : > { %v1219_v37 = vpop.f32.mrf.mxu3 }
 0x45e   : > { %v1220_v38 = vadd.f32 %v1732_v35, %v1219_v37 }
 0x460   : > { %v2141_v39 = vadd.f32 %v1220_v38, %v2077_v15 }
 0x461   : > { %v1214_v40 = vpop.f32.mrf.mxu1 }
 0x462   : > { %1230 = vst.msk [vmem:[#allocation2 + $0x10] sm:$0xff] %vm692_vm2, %v2141_v39  ;;  %v1215_v41 = vadd.f32 %v1732_v35, %v1214_v40 }
 0x464   : > { %v2146_v42 = vadd.f32 %v1215_v41, %v2092_v12 }
 0x465   : > { %v1221_v43 = vpop.f32.mrf.mxu3 }
 0x466   : > { %1228 = vst.msk [vmem:[#allocation2] sm:$0xff] %vm692_vm2, %v2146_v42  ;;  %v1222_v44 = vadd.f32 %v1732_v35, %v1221_v43 }
 0x468   : > { %v2151_v45 = vadd.f32 %v1222_v44, %v2085_v21 }
 0x469   : > { %v1216_v46 = vpop.f32.mrf.mxu1 }
 0x46a   : > { %1231 = vst.msk [vmem:[#allocation2 + $0x18] sm:$0xff] %vm692_vm2, %v2151_v45  ;;  %v1217_v15 = vadd.f32 %v1732_v35, %v1216_v46  ;;  %1235 = sbr.rel (%p1645_p6) target bundleno = 1453 (0x5ad), region = 84 }
 0x46c   : > { %v2156_v47 = vadd.f32 %v1217_v15, %v2094_v13 }
 0x46e   : > { %1229 = vst.msk [vmem:[#allocation2 + $0x8] sm:$0xff] %vm692_vm2, %v2156_v47 }
 0x46f   : > { %v1244_v12 = vsel %vm692_vm2, %v2141_v39, 0.0  ;;  %v1238_v21 = vsel %vm692_vm2, %v2146_v42, 0.0  ;;  %v1254_v48 = vmul.f32 %v2146_v42, %v2146_v42  ;;  %v1255_v49 = vmul.f32 %v2156_v47, %v2156_v47  ;;  %v1679_v9 = vld [vmem:[%s2254_s12 + $0x8] sm:$0xff]  ;;  %v1678_v18 = vld [vmem:[%s2254_s12] sm:$0xff] }
 0x470   : > { %1245 = vadd.xlane.f32.xlu1 %v1244_v12  ;;  %1239 = vadd.xlane.f32.xlu0 %v1238_v21  ;;  %v1247_v51 = vsel %vm692_vm2, %v2151_v45, 0.0  ;;  %v1241_v52 = vsel %vm692_vm2, %v2156_v47, 0.0  ;;  %v1257_v55 = vmul.f32 %v2151_v45, %v2151_v45  ;;  %v1256_v56 = vmul.f32 %v2141_v39, %v2141_v39  ;;  %v1767_v44 = vld [vmem:[%s2252_s10] ss:$0 sm:$0xff] }
 0x471   : > { %v1258_v13 = vsel %vm692_vm2, %v1254_v48, 0.0  ;;  %v1261_v54 = vsel %vm692_vm2, %v1255_v49, 0.0  ;;  %1407 = vmatpush.bf16.msra.mxu0 %v1679_v9  ;;  %vm1375_vm13 = vcmask 1040384   ;;  %vm1414_vm14 = vcmask 74752  }
 0x472   : > { %1259 = vadd.xlane.f32.xlu2 %v1258_v13  ;;  %v1267_v57 = vsel %vm692_vm2, %v1257_v55, 0.0  ;;  %v1264_v58 = vsel %vm692_vm2, %v1256_v56, 0.0  ;;  %v1838_v56 = vmov 16.0  }
 0x475   : > { %1408 = vmatpush.bf16.msra.mxu0 %v1678_v18 }
 0x478   : > { %1248 = vadd.xlane.f32.xlu1 %v1247_v51  ;;  %1242 = vadd.xlane.f32.xlu0 %v1241_v52  ;;  %v1768_v51 = vld [vmem:[%s2268_s20] ss:$0 sm:$0xff] }
 0x47a   : > { %1262 = vadd.xlane.f32.xlu2 %v1261_v54 }
 0x480   : > { %1268 = vadd.xlane.f32.xlu1 %v1267_v57  ;;  %1265 = vadd.xlane.f32.xlu0 %v1264_v58 }
 0x4e3   : > { %v1246_v59 = vpop.xlane.xlu1 %1245  ;;  %v1240_v60 = vpop.xlane.xlu0 %1239 }
 0x4e4   : > { %v1250_v61 = vmul.f32 %v1240_v60, %v2021_v36  ;;  %v2189_v6 = vmul.f32 %v1246_v59, %v2021_v36 }
 0x4e5   : > { %v1260_v50 = vpop.xlane.xlu2 %1259 }
 0x4e6   : > { %v1274_v62 = vmul.f32 %v1250_v61, %v1250_v61  ;;  %v1270_v63 = vmul.f32 %v1260_v50, %v2021_v36  ;;  %v1276_v19 = vmul.f32 %v2189_v6, %v2189_v6 }
 0x4e8   : > { %v1278_v53 = vsub.f32 %v1270_v63, %v1274_v62  ;;  %v1284_v63 = vsub.f32 %v2141_v39, %v2189_v6 }
 0x4ea   : > { %v1286_v0 = vadd.f32 1e-05, %v1278_v53 }
 0x4eb   : > { %v1249_v1 = vpop.xlane.xlu1 %1248  ;;  %v1243_v2 = vpop.xlane.xlu0 %1242 }
 0x4ec   : > { %v2184_v3 = vmul.f32 %v1243_v2, %v2021_v36  ;;  %1770 = vrsqrt.f32 %v1286_v0  ;;  %v2193_v14 = vmul.f32 %v1249_v1, %v2021_v36  ;;  %vm1296_vm0 = vweird.f32 %v1286_v0 }
 0x4ed   : > { %v1263_v4 = vpop.xlane.xlu2 %1262 }
 0x4ee   : > { %v1275_v5 = vmul.f32 %v2184_v3, %v2184_v3  ;;  %v1271_v7 = vmul.f32 %v1263_v4, %v2021_v36  ;;  %v1277_v22 = vmul.f32 %v2193_v14, %v2193_v14 }
 0x4f0   : > { %v1279_v8 = vsub.f32 %v1271_v7, %v1275_v5 }
 0x4f2   : > { %v1771_v10 = vpop.eup %1770  ;;  %v1287_v11 = vadd.f32 1e-05, %v1279_v8 }
 0x4f3   : > { %v1269_v16 = vpop.xlane.xlu1 %1268  ;;  %v1266_v17 = vpop.xlane.xlu0 %1265  ;;  %v1291_v20 = vmul.f32 %v1771_v10, %v1286_v0  ;;  %vm1297_vm15 = vweird.f32 %v1771_v10 }
 0x4f4   : > { %v1273_v23 = vmul.f32 %v1269_v16, %v2021_v36  ;;  %v1272_v24 = vmul.f32 %v1266_v17, %v2021_v36  ;;  %1772 = vrsqrt.f32 %v1287_v11  ;;  %vm1298_vm1 = vmor %vm1296_vm0, %vm1297_vm15  ;;  %v1282_v36 = vsub.f32 %v2146_v42, %v1250_v61 }
 0x4f5   : > { %v1292_v25 = vmul.f32 %v1771_v10, %v1291_v20  ;;  %vm1306_vm4 = vweird.f32 %v1287_v11  ;;  %v1283_v42 = vsub.f32 %v2156_v47, %v2184_v3  ;;  %v1285_v47 = vsub.f32 %v2151_v45, %v2193_v14 }
 0x4f6   : > { %v1281_v26 = vsub.f32 %v1273_v23, %v1277_v22  ;;  %v1280_v27 = vsub.f32 %v1272_v24, %v1276_v19 }
 0x4f7   : > { %v1293_v28 = vmul.f32 0.5, %v1292_v25 }
 0x4f8   : > { %v1289_v29 = vadd.f32 1e-05, %v1281_v26  ;;  %v1288_v30 = vadd.f32 1e-05, %v1280_v27 }
 0x4f9   : > { %v1294_v31 = vsub.f32 1.5, %v1293_v28 }
 0x4fa   : > { %1774 = vrsqrt.f32 %v1289_v29  ;;  %v1773_v32 = vpop.eup %1772  ;;  %vm1326_vm8 = vweird.f32 %v1289_v29  ;;  %vm1316_vm10 = vweird.f32 %v1288_v30 }
 0x4fb   : > { %1776 = vrsqrt.f32 %v1288_v30  ;;  %v1295_v33 = vmul.f32 %v1771_v10, %v1294_v31  ;;  %v1301_v34 = vmul.f32 %v1773_v32, %v1287_v11  ;;  %vm1307_vm3 = vweird.f32 %v1773_v32 }
 0x4fc   : > { %vm1308_vm5 = vmor %vm1306_vm4, %vm1307_vm3  ;;  %1778 = vrcp.f32 %v1838_v56 }
 0x4fd   : > { %v1299_v35 = vsel %vm1298_vm1, %v1771_v10, %v1295_v33  ;;  %v1302_v37 = vmul.f32 %v1773_v32, %v1301_v34 }
 0x4fe   : > { %v1330_v43 = vmul.f32 %v1299_v35, %v1282_v36 }
 0x4ff   : > { %v1303_v40 = vmul.f32 0.5, %v1302_v37 }
 0x500   : > { %v1775_v38 = vpop.eup %1774  ;;  %v1337_v49 = vmul.f32 %v1767_v44, %v1330_v43 }
 0x501   : > { %v1777_v41 = vpop.eup %1776  ;;  %v1321_v46 = vmul.f32 %v1775_v38, %v1289_v29  ;;  %v1304_v15 = vsub.f32 1.5, %v1303_v40  ;;  %vm1327_vm6 = vweird.f32 %v1775_v38 }
 0x502   : > { %v1311_v12 = vmul.f32 %v1777_v41, %v1288_v30  ;;  %vm1317_vm7 = vweird.f32 %v1777_v41  ;;  %v1344_v50 = vadd.f32 %v1768_v51, %v1337_v49  ;;  %vm1328_vm9 = vmor %vm1326_vm8, %vm1327_vm6  ;;  %v1779_v1 = vpop.eup %1778 }
 0x503   : > { %v1322_v21 = vmul.f32 %v1775_v38, %v1321_v46  ;;  %v1305_v48 = vmul.f32 %v1773_v32, %v1304_v15  ;;  %vm1318_vm11 = vmor %vm1316_vm10, %vm1317_vm7  ;;  %v1358_v14 = vmul.f32 16.0, %v1779_v1  ;;  %vm1362_vm12 = vweird.f32 %v1779_v1 }
 0x504   : > { %v1312_v13 = vmul.f32 %v1777_v41, %v1311_v12  ;;  %v1348_v5 = vsel %vm692_vm2, %v1344_v50, 0.0 }
 0x505   : > { %v1323_v52 = vmul.f32 0.5, %v1322_v21  ;;  %v1309_v54 = vsel %vm1308_vm5, %v1773_v32, %v1305_v48  ;;  %v1359_v6 = vsub.f32 1.0, %v1358_v14 }
 0x506   : > { %v1313_v55 = vmul.f32 0.5, %v1312_v13  ;;  %v1331_v57 = vmul.f32 %v1309_v54, %v1283_v42 }
 0x507   : > { %v1324_v58 = vsub.f32 1.5, %v1323_v52  ;;  %v1360_v24 = vmul.f32 %v1779_v1, %v1359_v6 }
 0x508   : > { %v1314_v59 = vsub.f32 1.5, %v1313_v55  ;;  %v1338_v60 = vmul.f32 %v1767_v44, %v1331_v57 }
 0x509   : > { %v1325_v61 = vmul.f32 %v1775_v38, %v1324_v58  ;;  %v1361_v28 = vadd.f32 %v1779_v1, %v1360_v24 }
 0x50a   : > { %v1315_v62 = vmul.f32 %v1777_v41, %v1314_v59  ;;  %v1345_v53 = vadd.f32 %v1768_v51, %v1338_v60 }
 0x50b   : > { %v1329_v0 = vsel %vm1328_vm9, %v1775_v38, %v1325_v61  ;;  %v1363_v32 = vsel %vm1362_vm12, %v1779_v1, %v1361_v28  ;;  %v1769_v38 = vld [vmem:[%s2269_s21] ss:$0 sm:$0xff] }
 0x50c   : > { %v1333_v2 = vmul.f32 %v1329_v0, %v1285_v47  ;;  %v1319_v3 = vsel %vm1318_vm11, %v1777_v41, %v1315_v62  ;;  %v1349_v7 = vsel %vm692_vm2, %v1345_v53, 0.0 }
 0x50d   : > { %v1332_v4 = vmul.f32 %v1319_v3, %v1284_v63  ;;  %v1350_v9 = vadd.f32 %v1349_v7, %v1348_v5 }
 0x50e   : > { %v1340_v8 = vmul.f32 %v1767_v44, %v1333_v2 }
 0x50f   : > { %v1339_v45 = vmul.f32 %v1767_v44, %v1332_v4  ;;  %v1351_v19 = vrot.slane %v1350_v9, 4 }
 0x510   : > { %v1347_v10 = vadd.f32 %v1768_v51, %v1340_v8 }
 0x511   : > { %v1346_v11 = vadd.f32 %v1768_v51, %v1339_v45  ;;  %v1352_v16 = vadd.f32 %v1351_v19, %v1350_v9 }
 0x512   : > { %v1366_v39 = vsel %vm692_vm2, %v1347_v10, 0.0 }
 0x513   : > { %v1365_v17 = vsel %vm692_vm2, %v1346_v11, 0.0  ;;  %v1353_v18 = vrot.slane %v1352_v16, 2 }
 0x514   : > { %v1367_v20 = vadd.f32 %v1366_v39, %v1365_v17 }
 0x515   : > { %v1354_v22 = vadd.f32 %v1353_v18, %v1352_v16 }
 0x516   : > { %v1368_v23 = vrot.slane %v1367_v20, 4 }
 0x517   : > { %v1355_v26 = vrot.slane %v1354_v22, 1 }
 0x518   : > { %v1369_v25 = vadd.f32 %v1368_v23, %v1367_v20 }
 0x519   : > { %v1356_v30 = vadd.f32 %v1355_v26, %v1354_v22 }
 0x51a   : > { %v1370_v27 = vrot.slane %v1369_v25, 2 }
 0x51b   : > { %v1364_v34 = vmul.f32 %v1363_v32, %v1356_v30 }
 0x51c   : > { %v1371_v29 = vadd.f32 %v1370_v27, %v1369_v25 }
 0x51e   : > { %v1372_v31 = vrot.slane %v1371_v29, 1 }
 0x520   : > { %v1373_v33 = vadd.f32 %v1372_v31, %v1371_v29 }
 0x522   : > { %v1374_v35 = vmul.f32 %v1373_v33, %v1363_v32 }
 0x524   : > { %v1376_v37 = vsel %vm1375_vm13, %v1364_v34, %v1374_v35 }
 0x525   : > { %v1377_v36 = vpack.c.bf16 %v1376_v37, %v1376_v37 }
 0x527   : > { %1654 = vmatmul.msk.bf16.vlgmr.msra.gmra.mxu0 %vm692_vm2, %v1377_v36 }
 0x5a4   : > { %v1410_v40 = vpop.f32.mrf.mxu0 }
 0x5a5   : > { %v1411_v41 = vadd.f32 %v1769_v38, %v1410_v40 }
 0x5a7   : > { %1415 = vst.msk [vmem:[#allocation3] sm:$0x3] %vm1414_vm14, %v1411_v41 }
 0x5ac   : > { %v1412_v43 = vpop.f32.mrf.mxu0 }
 0x5ad PF: > { %s2270_s22 = sld [smem:[#allocation7_spill]]  ;;  %s1839_s11 = smov [#allocation3]  }
 0x5ae   : > { %s2272_s30 = sld [smem:[#allocation12_spill]]  ;;  %s1424_s13 = sshll.u32 %s1839_s11, 4  ;;  %s1425_s13 = int_to_ptr.vmem [resolvable:$true] %s1424_s13 }
 0x5b3   : > { %s2271_s24 = sadd.s32 4294967295, %s2270_s22  }
 0x5b4   : > { %p1693_p7 = scmp.eq.s32.totalorder %s2271_s24, 1  ;;  %s1426_s17 = sshll.u32 %s2272_s30, 4  ;;  %s1427_s17 = int_to_ptr.hbm [resolvable:$true] %s1426_s17 }
 0x5b6   : > { %1690 = dma.vmem_to_hbm [thread:$0]  (%p1693_p7), %s1425_s13, 32, %s1427_s17, [#allocation4]  }
 0x5b7   : > { %1821 = dma.done.wait (%p1693_p7), [#allocation4], 32  }
 0x5b8   : > { %1823 = vsyncadd (%p1693_p7), [#allocation4], 4294967264 }
 0x5b9 PF: > { %s2273_s3 = sld [smem:[#allocation7_spill]] }
 0x5ba   : > { %s2274_s29 = sld [smem:[#allocation6_spill]] }
 0x5bb   : > { %s2275_s30 = sld [smem:[#allocation8_spill]] }
 0x5bf   : > { %s25_s15 = sadd.s32 1, %s2273_s3  }
 0x5c0   : > { %p22_p8 = scmp.ge.s32.totalorder %s25_s15, 4  }
 0x5c2   :  { %24 = sbr.rel (!%p22_p8) target bundleno = 7 (0x7), region = 133 }
 0x5c7   :  { %1440 = vsyncpa [#allocation4], 1 }
 0x5c8   :  { %1442 = vsyncpa [#allocation4 + $0x1], 1 }

</bundles_post_ra>
